<compile_context>
chip_gen: v7x
topology: tpu7x:2x2x1
jax: 0.10.0
libtpu: 0.0.40
codegen_flags: <defaults>
</compile_context>

<pallas_src>
import functools

import jax
import jax.numpy as jnp
from jax.experimental import pallas as pl
from jax.experimental.pallas import tpu as pltpu

_SQRT_HALF = 0.7071067811865476
PADDING = 9

_LANE_TILE = 2048                       # pixel (lane) tile for large images
_FULL_BLOCK_BYTES = 2 * 1024 * 1024     # below this, whole image in one block
_MODE_TILE = 8                          # Fourier modes per grid step


def _gelu(x):
    # Exact (erf) GELU, matching torch.nn.functional.gelu default.
    return 0.5 * x * (1.0 + jax.lax.erf(x * _SQRT_HALF))


def _pix_tiling(npix, c):
    """Pick the pixel (lane) tile: whole image if small, else 2048-pixel tiles."""
    if npix * c * 4 <= _FULL_BLOCK_BYTES:
        return npix, 1, npix
    padded = pl.cdiv(npix, _LANE_TILE) * _LANE_TILE
    return _LANE_TILE, padded // _LANE_TILE, padded


def _parallel(n):
    return pltpu.CompilerParams(dimension_semantics=("parallel",) * n)


# ---------------------------------------------------------------------------
# Pallas kernels (all channels-first: weights are (C_out, C_in), data (C, pix))
# ---------------------------------------------------------------------------

def _trunk_kernel(xi_ref, w_ref, b_ref, o_ref):
    # trunk encoder: xi @ W + b   (Linear xi_dim -> width)
    o_ref[...] = (jnp.dot(xi_ref[...], w_ref[...],
                          preferred_element_type=jnp.float32) + b_ref[...])


def _encoder_kernel(feat_ref, t_ref, w_ref, b_ref, o_ref):
    # branch encoder (1x1 conv, 3 -> width) fused with the per-channel trunk
    # scaling (einsum 'bcxy,bc->bcxy'); scaling commutes with zero-padding.
    enc = (jnp.dot(w_ref[...], feat_ref[0],
                   preferred_element_type=jnp.float32) + b_ref[...])
    o_ref[0] = enc * t_ref[0]                        # t_ref[0] is (C, 1)


def _branch_layer_kernel(x_ref, f_ref, wc_ref, bc_ref, w1_ref, b1_ref,
                         w2_ref, b2_ref, o_ref, *, apply_gelu):
    # t = conv(x); t = gelu(conv1(t)); t = conv2(t); y = fourier + t; [gelu]
    x = x_ref[0]                                                       # (C, P)
    t = jnp.dot(wc_ref[...], x, preferred_element_type=jnp.float32) + bc_ref[...]
    t = _gelu(jnp.dot(w1_ref[...], t, preferred_element_type=jnp.float32) + b1_ref[...])
    t = jnp.dot(w2_ref[...], t, preferred_element_type=jnp.float32) + b2_ref[...]
    y = f_ref[0] + t
    if apply_gelu:
        y = _gelu(y)
    o_ref[0] = y


def _outproj_kernel(x_ref, w1_ref, b1_ref, w2_ref, b2_ref, o_ref):
    # output MLP: conv1(width->width) -> gelu -> conv2(width->1); output block
    # is (1, pix_tile): lane-dense, unmasked stores.
    h = _gelu(jnp.dot(w1_ref[...], x_ref[0],
                      preferred_element_type=jnp.float32) + b1_ref[...])
    o_ref[0] = (jnp.dot(w2_ref[...], h,
                        preferred_element_type=jnp.float32) + b2_ref[...])


def _cmul_kernel(x_ref, w_ref, o_ref, *, mt):
    # Block-complex per-mode channel mixing: one dot per mode,
    # [xr | xi] @ [[wr, wi], [-wi, wr]] = [yr | yi].  mt modes per grid step.
    for j in range(mt):
        o_ref[j] = jnp.dot(x_ref[j], w_ref[j], preferred_element_type=jnp.float32)


# ---------------------------------------------------------------------------
# Wrappers
# ---------------------------------------------------------------------------

def trunk_encode(xi, wt, bt):
    b, d = xi.shape
    c = wt.shape[1]
    return pl.pallas_call(
        _trunk_kernel,
        out_shape=jax.ShapeDtypeStruct((b, c), jnp.float32),
        grid=(1,),
        in_specs=[
            pl.BlockSpec((b, d), lambda i: (0, 0)),
            pl.BlockSpec((d, c), lambda i: (0, 0)),
            pl.BlockSpec((1, c), lambda i: (0, 0)),
        ],
        out_specs=pl.BlockSpec((b, c), lambda i: (0, 0)),
    )(xi, wt, bt.reshape(1, -1))


def encode_and_scale(feat, tscale, w_in, b_in):
    # feat: (B, 3, Npix); tscale: (B, C, 1)
    b, cin, npix = feat.shape
    c = w_in.shape[0]
    tile, ntiles, padded = _pix_tiling(npix, c)
    if padded != npix:
        feat = jnp.pad(feat, ((0, 0), (0, 0), (0, padded - npix)))
    out = pl.pallas_call(
        _encoder_kernel,
        out_shape=jax.ShapeDtypeStruct((b, c, padded), jnp.float32),
        grid=(b, ntiles),
        in_specs=[
            pl.BlockSpec((1, cin, tile), lambda i, j: (i, 0, j)),
            pl.BlockSpec((1, c, 1), lambda i, j: (i, 0, 0)),
            pl.BlockSpec((c, cin), lambda i, j: (0, 0)),
            pl.BlockSpec((c, 1), lambda i, j: (0, 0)),
        ],
        out_specs=pl.BlockSpec((1, c, tile), lambda i, j: (i, 0, j)),
        compiler_params=_parallel(2),
    )(feat, tscale, w_in, b_in.reshape(-1, 1))
    if padded != npix:
        out = out[:, :, :npix]
    return out


def branch_layer(x4, f4, wc, bc, w1, b1, w2, b2, apply_gelu):
    b, c, hp, wp = x4.shape
    npix = hp * wp
    tile, ntiles, padded = _pix_tiling(npix, c)
    xf = x4.reshape(b, c, npix)
    ff = f4.reshape(b, c, npix)
    if padded != npix:
        xf = jnp.pad(xf, ((0, 0), (0, 0), (0, padded - npix)))
        ff = jnp.pad(ff, ((0, 0), (0, 0), (0, padded - npix)))
    kernel = functools.partial(_branch_layer_kernel, apply_gelu=apply_gelu)
    out = pl.pallas_call(
        kernel,
        out_shape=jax.ShapeDtypeStruct((b, c, padded), jnp.float32),
        grid=(b, ntiles),
        in_specs=[
            pl.BlockSpec((1, c, tile), lambda i, j: (i, 0, j)),
            pl.BlockSpec((1, c, tile), lambda i, j: (i, 0, j)),
            pl.BlockSpec((c, c), lambda i, j: (0, 0)),
            pl.BlockSpec((c, 1), lambda i, j: (0, 0)),
            pl.BlockSpec((c, c), lambda i, j: (0, 0)),
            pl.BlockSpec((c, 1), lambda i, j: (0, 0)),
            pl.BlockSpec((c, c), lambda i, j: (0, 0)),
            pl.BlockSpec((c, 1), lambda i, j: (0, 0)),
        ],
        out_specs=pl.BlockSpec((1, c, tile), lambda i, j: (i, 0, j)),
        compiler_params=_parallel(2),
    )(xf, ff, wc, bc.reshape(-1, 1), w1, b1.reshape(-1, 1), w2, b2.reshape(-1, 1))
    if padded != npix:
        out = out[:, :, :npix]
    return out.reshape(b, c, hp, wp)


def output_proj(x4, w1, b1, w2, b2):
    b, c, h, w = x4.shape
    npix = h * w
    tile, ntiles, padded = _pix_tiling(npix, c)
    xf = x4.reshape(b, c, npix)
    if padded != npix:
        xf = jnp.pad(xf, ((0, 0), (0, 0), (0, padded - npix)))
    out = pl.pallas_call(
        _outproj_kernel,
        out_shape=jax.ShapeDtypeStruct((b, 1, padded), jnp.float32),
        grid=(b, ntiles),
        in_specs=[
            pl.BlockSpec((1, c, tile), lambda i, j: (i, 0, j)),
            pl.BlockSpec((c, c), lambda i, j: (0, 0)),
            pl.BlockSpec((c, 1), lambda i, j: (0, 0)),
            pl.BlockSpec((1, c), lambda i, j: (0, 0)),
            pl.BlockSpec((1, 1), lambda i, j: (0, 0)),
        ],
        out_specs=pl.BlockSpec((1, 1, tile), lambda i, j: (i, 0, j)),
        compiler_params=_parallel(2),
    )(xf, w1, b1.reshape(-1, 1), w2, b2.reshape(1, 1))
    if padded != npix:
        out = out[:, :, :npix]
    return out.reshape(b, 1, h, w)


def complex_mult_pallas(xin, wblk):
    # xin: (2M, B, 2C) = [xr | xi];  wblk: (2M, 2C, 2C) block-complex weights.
    m2, b, c2 = xin.shape
    mpad = pl.cdiv(m2, _MODE_TILE) * _MODE_TILE
    if mpad != m2:
        xin = jnp.pad(xin, ((0, mpad - m2), (0, 0), (0, 0)))
        wblk = jnp.pad(wblk, ((0, mpad - m2), (0, 0), (0, 0)))
    kernel = functools.partial(_cmul_kernel, mt=_MODE_TILE)
    out = pl.pallas_call(
        kernel,
        out_shape=jax.ShapeDtypeStruct((mpad, b, c2), jnp.float32),
        grid=(mpad // _MODE_TILE,),
        in_specs=[
            pl.BlockSpec((_MODE_TILE, b, c2), lambda t: (t, 0, 0)),
            pl.BlockSpec((_MODE_TILE, c2, c2), lambda t: (t, 0, 0)),
        ],
        out_specs=pl.BlockSpec((_MODE_TILE, b, c2), lambda t: (t, 0, 0)),
        compiler_params=_parallel(1),
    )(xin, wblk)
    return out[:m2]


# ---------------------------------------------------------------------------
# FourierConv2d: FFT in XLA, per-mode complex channel mixing in Pallas.
# ---------------------------------------------------------------------------

def _wblock(w_r, w_i):
    # (C_in, C_out, mx, my) real/imag parts -> (m, 2C_in, 2C_out) block weights
    # [[wr, wi], [-wi, wr]]  (one-time wrapper-side prep).
    c_in, c_out, mx, my = w_r.shape
    m = mx * my
    wr = jnp.transpose(w_r.reshape(c_in, c_out, m), (2, 0, 1))
    wi = jnp.transpose(w_i.reshape(c_in, c_out, m), (2, 0, 1))
    top = jnp.concatenate([wr, wi], axis=2)
    bot = jnp.concatenate([-wi, wr], axis=2)
    return jnp.concatenate([top, bot], axis=1)


def fourier_conv2d(x, wl_r, wl_i, wh_r, wh_i, mx, my):
    # TODO(synk): rfft2/irfft2 have no Pallas equivalent; they run in XLA.
    b, c, hp, wp = x.shape
    wf = wp // 2 + 1
    m = mx * my
    xf = jnp.fft.rfft2(x, axes=(2, 3))                       # (B,C,Hp,Wf) c64

    low = xf[:, :, :mx, :my].reshape(b, c, m)
    high = xf[:, :, hp - mx:, :my].reshape(b, c, m)
    xm = jnp.concatenate([low, high], axis=2)                # (B, C, 2M)
    xm = jnp.transpose(xm, (2, 0, 1))                        # (2M, B, C)
    xin = jnp.concatenate([jnp.real(xm), jnp.imag(xm)],
                          axis=-1).astype(jnp.float32)       # (2M, B, 2C)

    wblk = jnp.concatenate([_wblock(wl_r, wl_i), _wblock(wh_r, wh_i)],
                           axis=0)                           # (2M, 2C, 2C)

    y = complex_mult_pallas(xin, wblk)                       # (2M, B, 2C)
    yc = jax.lax.complex(y[..., :c], y[..., c:])             # (2M, B, C)
    yc = jnp.transpose(yc, (1, 2, 0))                        # (B, C, 2M)
    ylow = yc[:, :, :m].reshape(b, c, mx, my)
    yhigh = yc[:, :, m:].reshape(b, c, mx, my)

    out_f = jnp.zeros((b, c, hp, wf), dtype=jnp.complex64)
    out_f = out_f.at[:, :, :mx, :my].set(ylow)
    out_f = out_f.at[:, :, hp - mx:, :my].set(yhigh)
    return jnp.fft.irfft2(out_f, s=(hp, wp), axes=(2, 3)).astype(jnp.float32)


# ---------------------------------------------------------------------------
# FDON2d_II forward
# ---------------------------------------------------------------------------

def fdon2d_forward(params, z, xi):
    """z: (B, 1, H, W); xi: (B, xi_dim). Returns (B, 1, H, W) like torch."""
    b, _, h, w = z.shape
    z = z.astype(jnp.float32)

    # grid features, channel order [z, grid_x, grid_y] (NCHW like torch)
    gx = jnp.broadcast_to(
        jnp.linspace(0.0, 1.0, h, dtype=jnp.float32).reshape(1, 1, h, 1),
        (b, 1, h, w))
    gy = jnp.broadcast_to(
        jnp.linspace(0.0, 1.0, w, dtype=jnp.float32).reshape(1, 1, 1, w),
        (b, 1, h, w))
    feat = jnp.concatenate([z, gx, gy], axis=1)              # (B, 3, H, W)

    # trunk encoder (Linear xi_dim -> width) — tiny Pallas kernel
    t = trunk_encode(xi.astype(jnp.float32), params["wt"], params["bt"])
    width = params["w_in"].shape[0]
    tscale = t.reshape(b, width, 1)

    # branch encoder + early trunk scaling (fused), then spatial zero-pad
    xb = encode_and_scale(feat.reshape(b, 3, h * w), tscale,
                          params["w_in"], params["b_in"])
    x = xb.reshape(b, width, h, w)
    x = jnp.pad(x, ((0, 0), (0, 0), (0, PADDING), (0, PADDING)))

    num_layers = len(params["fourier"])
    for i in range(num_layers):
        fl = params["fourier"][i]
        f = fourier_conv2d(x, fl["wl_r"], fl["wl_i"], fl["wh_r"], fl["wh_i"],
                           params["modes_x"], params["modes_y"])
        bl = params["branch"][i]
        x = branch_layer(x, f, bl["wc"], bl["bc"], bl["w1"], bl["b1"],
                         bl["w2"], bl["b2"],
                         apply_gelu=(i < num_layers - 1))

    x = x[:, :, :h, :w]                                      # crop padding
    return output_proj(x, params["wo1"], params["bo1"],
                       params["wo2"], params["bo2"])         # (B, 1, H, W)


# ---------------------------------------------------------------------------
# Deterministic parameter init (weights stored channels-first: (C_out, C_in))
# ---------------------------------------------------------------------------

def init_params(key, xi_dim, modes_x, modes_y, width, num_layers):
    keys = iter(jax.random.split(key, 64 + 16 * num_layers))

    def u(shape, scale=0.1):
        return (scale * jax.random.uniform(next(keys), shape)).astype(jnp.float32)

    params = {"modes_x": modes_x, "modes_y": modes_y}
    params["w_in"] = u((width, 3))
    params["b_in"] = u((width,))
    params["wt"] = u((xi_dim, width))
    params["bt"] = u((width,))

    fscale = 1.0 / (width * width)
    params["fourier"] = []
    params["branch"] = []
    for _ in range(num_layers):
        params["fourier"].append({
            "wl_r": u((width, width, modes_x, modes_y), fscale),
            "wl_i": u((width, width, modes_x, modes_y), fscale),
            "wh_r": u((width, width, modes_x, modes_y), fscale),
            "wh_i": u((width, width, modes_x, modes_y), fscale),
        })
        params["branch"].append({
            "wc": u((width, width)), "bc": u((width,)),   # conv_layers[i]
            "w1": u((width, width)), "b1": u((width,)),   # mlp conv1
            "w2": u((width, width)), "b2": u((width,)),   # mlp conv2
        })

    params["wo1"] = u((width, width))
    params["bo1"] = u((width,))
    params["wo2"] = u((1, width))
    params["bo2"] = u((1,))
    return params


if __name__ == "__main__":
    B, H, W = 2, 16, 16
    XI_DIM, WIDTH = 4, 8
    MODES_X, MODES_Y = 4, 4
    NUM_LAYERS = 2

    key = jax.random.PRNGKey(0)
    kp, kz, kxi = jax.random.split(key, 3)
    params = init_params(kp, XI_DIM, MODES_X, MODES_Y, WIDTH, NUM_LAYERS)

    z = jax.random.normal(kz, (B, 1, H, W), dtype=jnp.float32)
    xi = jax.random.normal(kxi, (B, XI_DIM), dtype=jnp.float32)

    fwd = jax.jit(lambda zz, xx: fdon2d_forward(params, zz, xx))
    out = jax.block_until_ready(fwd(z, xi))

    assert out.shape == (B, 1, H, W), out.shape
    assert bool(jnp.all(jnp.isfinite(out)))
    print("KERNEL_OK")
</pallas_src>

<mosaic_0001>
module attributes {stable_mosaic.version = 11 : i64} {
  func.func @_trunk_kernel(%arg0: i32, %arg1: memref<2x4xf32, #tpu.memory_space<vmem>>, %arg2: memref<4x8xf32, #tpu.memory_space<vmem>>, %arg3: memref<1x8xf32, #tpu.memory_space<vmem>>, %arg4: memref<2x8xf32, #tpu.memory_space<vmem>>) attributes {dimension_semantics = [#tpu.dimension_semantics<arbitrary>], iteration_bounds = array<i64: 1>, scalar_prefetch = 0 : i64, scratch_operands = 0 : i64, tpu.core_type = #tpu.core_type<tc>, window_params = [{pipeline_mode = #tpu.pipeline_mode<synchronous>, transform_indices = @transform_0, window_bounds = array<i64: 2, 4>}, {pipeline_mode = #tpu.pipeline_mode<synchronous>, transform_indices = @transform_1, window_bounds = array<i64: 4, 8>}, {pipeline_mode = #tpu.pipeline_mode<synchronous>, transform_indices = @transform_2, window_bounds = array<i64: 1, 8>}, {pipeline_mode = #tpu.pipeline_mode<synchronous>, transform_indices = @transform_3, window_bounds = array<i64: 2, 8>}]} {
    %c0 = arith.constant 0 : index
    %c0_0 = arith.constant 0 : index
    %0 = vector.load %arg1[%c0, %c0_0] : memref<2x4xf32, #tpu.memory_space<vmem>>, vector<2x4xf32>
    %c0_1 = arith.constant 0 : index
    %c0_2 = arith.constant 0 : index
    %1 = vector.load %arg2[%c0_1, %c0_2] : memref<4x8xf32, #tpu.memory_space<vmem>>, vector<4x8xf32>
    %cst = arith.constant dense<0.000000e+00> : vector<2x8xf32>
    %2 = tpu.matmul %0, %1, %cst {dimension_numbers = #tpu.dot_dimension_numbers<[1], [0], [0], [1], [0, 0, 1, 1], [], []>} : vector<2x4xf32>, vector<4x8xf32>, vector<2x8xf32> -> vector<2x8xf32>
    %c0_3 = arith.constant 0 : index
    %c0_4 = arith.constant 0 : index
    %3 = vector.load %arg3[%c0_3, %c0_4] : memref<1x8xf32, #tpu.memory_space<vmem>>, vector<1x8xf32>
    %4 = vector.broadcast %3 : vector<1x8xf32> to vector<2x8xf32>
    %5 = arith.addf %2, %4 : vector<2x8xf32>
    %c0_5 = arith.constant 0 : index
    %c0_6 = arith.constant 0 : index
    %6 = vector.load %arg4[%c0_5, %c0_6] : memref<2x8xf32, #tpu.memory_space<vmem>>, vector<2x8xf32>
    tpu.vector_store %arg4[%c0_5, %c0_6], %5 {strides = array<i32>} : memref<2x8xf32, #tpu.memory_space<vmem>>, vector<2x8xf32>,
    return
  }
  func.func @transform_0(%arg0: i32) -> (i32, i32) {
    %c0_i32 = arith.constant 0 : i32
    %c0_i32_0 = arith.constant 0 : i32
    %c0_i32_1 = arith.constant 0 : i32
    return %c0_i32, %c0_i32_0 : i32, i32
  }
  func.func @transform_1(%arg0: i32) -> (i32, i32) {
    %c0_i32 = arith.constant 0 : i32
    %c0_i32_0 = arith.constant 0 : i32
    %c0_i32_1 = arith.constant 0 : i32
    return %c0_i32, %c0_i32_0 : i32, i32
  }
  func.func @transform_2(%arg0: i32) -> (i32, i32) {
    %c0_i32 = arith.constant 0 : i32
    %c0_i32_0 = arith.constant 0 : i32
    %c0_i32_1 = arith.constant 0 : i32
    return %c0_i32, %c0_i32_0 : i32, i32
  }
  func.func @transform_3(%arg0: i32) -> (i32, i32) {
    %c0_i32 = arith.constant 0 : i32
    %c0_i32_0 = arith.constant 0 : i32
    %c0_i32_1 = arith.constant 0 : i32
    return %c0_i32, %c0_i32_0 : i32, i32
  }
}

module attributes {stable_mosaic.version = 11 : i64} {
  func.func @_encoder_kernel(%arg0: i32, %arg1: i32, %arg2: memref<1x3x256xf32, #tpu.memory_space<vmem>>, %arg3: memref<1x8x1xf32, #tpu.memory_space<vmem>>, %arg4: memref<8x3xf32, #tpu.memory_space<vmem>>, %arg5: memref<8x1xf32, #tpu.memory_space<vmem>>, %arg6: memref<1x8x256xf32, #tpu.memory_space<vmem>>) attributes {dimension_semantics = [#tpu.dimension_semantics<parallel>, #tpu.dimension_semantics<parallel>], iteration_bounds = array<i64: 2, 1>, scalar_prefetch = 0 : i64, scratch_operands = 0 : i64, tpu.core_type = #tpu.core_type<tc>, window_params = [{transform_indices = @transform_0, window_bounds = array<i64: 1, 3, 256>}, {transform_indices = @transform_1, window_bounds = array<i64: 1, 8, 1>}, {pipeline_mode = #tpu.pipeline_mode<synchronous>, transform_indices = @transform_2, window_bounds = array<i64: 8, 3>}, {pipeline_mode = #tpu.pipeline_mode<synchronous>, transform_indices = @transform_3, window_bounds = array<i64: 8, 1>}, {transform_indices = @transform_4, window_bounds = array<i64: 1, 8, 256>}]} {
    %c0 = arith.constant 0 : index
    %c0_0 = arith.constant 0 : index
    %0 = vector.load %arg4[%c0, %c0_0] : memref<8x3xf32, #tpu.memory_space<vmem>>, vector<8x3xf32>
    %c0_1 = arith.constant 0 : index
    %c0_2 = arith.constant 0 : index
    %c0_3 = arith.constant 0 : index
    %1 = vector.load %arg2[%c0_1, %c0_2, %c0_3] : memref<1x3x256xf32, #tpu.memory_space<vmem>>, vector<1x3x256xf32>
    %2 = vector.shape_cast %1 : vector<1x3x256xf32> to vector<3x256xf32>
    %cst = arith.constant dense<0.000000e+00> : vector<8x256xf32>
    %3 = tpu.matmul %0, %2, %cst {dimension_numbers = #tpu.dot_dimension_numbers<[1], [0], [0], [1], [0, 0, 1, 1], [], []>} : vector<8x3xf32>, vector<3x256xf32>, vector<8x256xf32> -> vector<8x256xf32>
    %c0_4 = arith.constant 0 : index
    %c0_5 = arith.constant 0 : index
    %4 = vector.load %arg5[%c0_4, %c0_5] : memref<8x1xf32, #tpu.memory_space<vmem>>, vector<8x1xf32>
    %5 = vector.broadcast %4 : vector<8x1xf32> to vector<8x256xf32>
    %6 = arith.addf %3, %5 : vector<8x256xf32>
    %c0_6 = arith.constant 0 : index
    %c0_7 = arith.constant 0 : index
    %c0_8 = arith.constant 0 : index
    %7 = vector.load %arg3[%c0_6, %c0_7, %c0_8] : memref<1x8x1xf32, #tpu.memory_space<vmem>>, vector<1x8x1xf32>
    %8 = vector.shape_cast %7 : vector<1x8x1xf32> to vector<8x1xf32>
    %9 = vector.broadcast %8 : vector<8x1xf32> to vector<8x256xf32>
    %10 = arith.mulf %6, %9 : vector<8x256xf32>
    %c0_9 = arith.constant 0 : index
    %c0_10 = arith.constant 0 : index
    %c0_11 = arith.constant 0 : index
    %11 = vector.load %arg6[%c0_9, %c0_10, %c0_11] : memref<1x8x256xf32, #tpu.memory_space<vmem>>, vector<1x8x256xf32>
    %12 = vector.shape_cast %11 : vector<1x8x256xf32> to vector<8x256xf32>
    %13 = vector.shape_cast %10 : vector<8x256xf32> to vector<1x8x256xf32>
    tpu.vector_store %arg6[%c0_9, %c0_10, %c0_11], %13 {strides = array<i32>} : memref<1x8x256xf32, #tpu.memory_space<vmem>>, vector<1x8x256xf32>,
    return
  }
  func.func @transform_0(%arg0: i32, %arg1: i32) -> (i32, i32, i32) {
    %c0_i32 = arith.constant 0 : i32
    %c0_i32_0 = arith.constant 0 : i32
    return %arg0, %c0_i32, %arg1 : i32, i32, i32
  }
  func.func @transform_1(%arg0: i32, %arg1: i32) -> (i32, i32, i32) {
    %c0_i32 = arith.constant 0 : i32
    %c0_i32_0 = arith.constant 0 : i32
    %c0_i32_1 = arith.constant 0 : i32
    return %arg0, %c0_i32, %c0_i32_0 : i32, i32, i32
  }
  func.func @transform_2(%arg0: i32, %arg1: i32) -> (i32, i32) {
    %c0_i32 = arith.constant 0 : i32
    %c0_i32_0 = arith.constant 0 : i32
    %c0_i32_1 = arith.constant 0 : i32
    return %c0_i32, %c0_i32_0 : i32, i32
  }
  func.func @transform_3(%arg0: i32, %arg1: i32) -> (i32, i32) {
    %c0_i32 = arith.constant 0 : i32
    %c0_i32_0 = arith.constant 0 : i32
    %c0_i32_1 = arith.constant 0 : i32
    return %c0_i32, %c0_i32_0 : i32, i32
  }
  func.func @transform_4(%arg0: i32, %arg1: i32) -> (i32, i32, i32) {
    %c0_i32 = arith.constant 0 : i32
    %c0_i32_0 = arith.constant 0 : i32
    return %arg0, %c0_i32, %arg1 : i32, i32, i32
  }
}

module attributes {stable_mosaic.version = 11 : i64} {
  func.func @_cmul_kernel(%arg0: i32, %arg1: memref<8x2x16xf32, #tpu.memory_space<vmem>>, %arg2: memref<8x16x16xf32, #tpu.memory_space<vmem>>, %arg3: memref<8x2x16xf32, #tpu.memory_space<vmem>>) attributes {dimension_semantics = [#tpu.dimension_semantics<parallel>], iteration_bounds = array<i64: 4>, scalar_prefetch = 0 : i64, scratch_operands = 0 : i64, tpu.core_type = #tpu.core_type<tc>, window_params = [{transform_indices = @transform_0, window_bounds = array<i64: 8, 2, 16>}, {transform_indices = @transform_1, window_bounds = array<i64: 8, 16, 16>}, {transform_indices = @transform_2, window_bounds = array<i64: 8, 2, 16>}]} {
    %c0 = arith.constant 0 : index
    %c0_0 = arith.constant 0 : index
    %c0_1 = arith.constant 0 : index
    %0 = vector.load %arg1[%c0, %c0_0, %c0_1] : memref<8x2x16xf32, #tpu.memory_space<vmem>>, vector<1x2x16xf32>
    %1 = vector.shape_cast %0 : vector<1x2x16xf32> to vector<2x16xf32>
    %c0_2 = arith.constant 0 : index
    %c0_3 = arith.constant 0 : index
    %c0_4 = arith.constant 0 : index
    %2 = vector.load %arg2[%c0_2, %c0_3, %c0_4] : memref<8x16x16xf32, #tpu.memory_space<vmem>>, vector<1x16x16xf32>
    %3 = vector.shape_cast %2 : vector<1x16x16xf32> to vector<16x16xf32>
    %cst = arith.constant dense<0.000000e+00> : vector<2x16xf32>
    %4 = tpu.matmul %1, %3, %cst {dimension_numbers = #tpu.dot_dimension_numbers<[1], [0], [0], [1], [0, 0, 1, 1], [], []>} : vector<2x16xf32>, vector<16x16xf32>, vector<2x16xf32> -> vector<2x16xf32>
    %c0_5 = arith.constant 0 : index
    %c0_6 = arith.constant 0 : index
    %c0_7 = arith.constant 0 : index
    %5 = vector.load %arg3[%c0_5, %c0_6, %c0_7] : memref<8x2x16xf32, #tpu.memory_space<vmem>>, vector<1x2x16xf32>
    %6 = vector.shape_cast %5 : vector<1x2x16xf32> to vector<2x16xf32>
    %7 = vector.shape_cast %4 : vector<2x16xf32> to vector<1x2x16xf32>
    tpu.vector_store %arg3[%c0_5, %c0_6, %c0_7], %7 {strides = array<i32>} : memref<8x2x16xf32, #tpu.memory_space<vmem>>, vector<1x2x16xf32>,
    %c1 = arith.constant 1 : index
    %c0_8 = arith.constant 0 : index
    %c0_9 = arith.constant 0 : index
    %8 = vector.load %arg1[%c1, %c0_8, %c0_9] : memref<8x2x16xf32, #tpu.memory_space<vmem>>, vector<1x2x16xf32>
    %9 = vector.shape_cast %8 : vector<1x2x16xf32> to vector<2x16xf32>
    %c1_10 = arith.constant 1 : index
    %c0_11 = arith.constant 0 : index
    %c0_12 = arith.constant 0 : index
    %10 = vector.load %arg2[%c1_10, %c0_11, %c0_12] : memref<8x16x16xf32, #tpu.memory_space<vmem>>, vector<1x16x16xf32>
    %11 = vector.shape_cast %10 : vector<1x16x16xf32> to vector<16x16xf32>
    %cst_13 = arith.constant dense<0.000000e+00> : vector<2x16xf32>
    %12 = tpu.matmul %9, %11, %cst_13 {dimension_numbers = #tpu.dot_dimension_numbers<[1], [0], [0], [1], [0, 0, 1, 1], [], []>} : vector<2x16xf32>, vector<16x16xf32>, vector<2x16xf32> -> vector<2x16xf32>
    %c1_14 = arith.constant 1 : index
    %c0_15 = arith.constant 0 : index
    %c0_16 = arith.constant 0 : index
    %13 = vector.load %arg3[%c1_14, %c0_15, %c0_16] : memref<8x2x16xf32, #tpu.memory_space<vmem>>, vector<1x2x16xf32>
    %14 = vector.shape_cast %13 : vector<1x2x16xf32> to vector<2x16xf32>
    %15 = vector.shape_cast %12 : vector<2x16xf32> to vector<1x2x16xf32>
    tpu.vector_store %arg3[%c1_14, %c0_15, %c0_16], %15 {strides = array<i32>} : memref<8x2x16xf32, #tpu.memory_space<vmem>>, vector<1x2x16xf32>,
    %c2 = arith.constant 2 : index
    %c0_17 = arith.constant 0 : index
    %c0_18 = arith.constant 0 : index
    %16 = vector.load %arg1[%c2, %c0_17, %c0_18] : memref<8x2x16xf32, #tpu.memory_space<vmem>>, vector<1x2x16xf32>
    %17 = vector.shape_cast %16 : vector<1x2x16xf32> to vector<2x16xf32>
    %c2_19 = arith.constant 2 : index
    %c0_20 = arith.constant 0 : index
    %c0_21 = arith.constant 0 : index
    %18 = vector.load %arg2[%c2_19, %c0_20, %c0_21] : memref<8x16x16xf32, #tpu.memory_space<vmem>>, vector<1x16x16xf32>
    %19 = vector.shape_cast %18 : vector<1x16x16xf32> to vector<16x16xf32>
    %cst_22 = arith.constant dense<0.000000e+00> : vector<2x16xf32>
    %20 = tpu.matmul %17, %19, %cst_22 {dimension_numbers = #tpu.dot_dimension_numbers<[1], [0], [0], [1], [0, 0, 1, 1], [], []>} : vector<2x16xf32>, vector<16x16xf32>, vector<2x16xf32> -> vector<2x16xf32>
    %c2_23 = arith.constant 2 : index
    %c0_24 = arith.constant 0 : index
    %c0_25 = arith.constant 0 : index
    %21 = vector.load %arg3[%c2_23, %c0_24, %c0_25] : memref<8x2x16xf32, #tpu.memory_space<vmem>>, vector<1x2x16xf32>
    %22 = vector.shape_cast %21 : vector<1x2x16xf32> to vector<2x16xf32>
    %23 = vector.shape_cast %20 : vector<2x16xf32> to vector<1x2x16xf32>
    tpu.vector_store %arg3[%c2_23, %c0_24, %c0_25], %23 {strides = array<i32>} : memref<8x2x16xf32, #tpu.memory_space<vmem>>, vector<1x2x16xf32>,
    %c3 = arith.constant 3 : index
    %c0_26 = arith.constant 0 : index
    %c0_27 = arith.constant 0 : index
    %24 = vector.load %arg1[%c3, %c0_26, %c0_27] : memref<8x2x16xf32, #tpu.memory_space<vmem>>, vector<1x2x16xf32>
    %25 = vector.shape_cast %24 : vector<1x2x16xf32> to vector<2x16xf32>
    %c3_28 = arith.constant 3 : index
    %c0_29 = arith.constant 0 : index
    %c0_30 = arith.constant 0 : index
    %26 = vector.load %arg2[%c3_28, %c0_29, %c0_30] : memref<8x16x16xf32, #tpu.memory_space<vmem>>, vector<1x16x16xf32>
    %27 = vector.shape_cast %26 : vector<1x16x16xf32> to vector<16x16xf32>
    %cst_31 = arith.constant dense<0.000000e+00> : vector<2x16xf32>
    %28 = tpu.matmul %25, %27, %cst_31 {dimension_numbers = #tpu.dot_dimension_numbers<[1], [0], [0], [1], [0, 0, 1, 1], [], []>} : vector<2x16xf32>, vector<16x16xf32>, vector<2x16xf32> -> vector<2x16xf32>
    %c3_32 = arith.constant 3 : index
    %c0_33 = arith.constant 0 : index
    %c0_34 = arith.constant 0 : index
    %29 = vector.load %arg3[%c3_32, %c0_33, %c0_34] : memref<8x2x16xf32, #tpu.memory_space<vmem>>, vector<1x2x16xf32>
    %30 = vector.shape_cast %29 : vector<1x2x16xf32> to vector<2x16xf32>
    %31 = vector.shape_cast %28 : vector<2x16xf32> to vector<1x2x16xf32>
    tpu.vector_store %arg3[%c3_32, %c0_33, %c0_34], %31 {strides = array<i32>} : memref<8x2x16xf32, #tpu.memory_space<vmem>>, vector<1x2x16xf32>,
    %c4 = arith.constant 4 : index
    %c0_35 = arith.constant 0 : index
    %c0_36 = arith.constant 0 : index
    %32 = vector.load %arg1[%c4, %c0_35, %c0_36] : memref<8x2x16xf32, #tpu.memory_space<vmem>>, vector<1x2x16xf32>
    %33 = vector.shape_cast %32 : vector<1x2x16xf32> to vector<2x16xf32>
    %c4_37 = arith.constant 4 : index
    %c0_38 = arith.constant 0 : index
    %c0_39 = arith.constant 0 : index
    %34 = vector.load %arg2[%c4_37, %c0_38, %c0_39] : memref<8x16x16xf32, #tpu.memory_space<vmem>>, vector<1x16x16xf32>
    %35 = vector.shape_cast %34 : vector<1x16x16xf32> to vector<16x16xf32>
    %cst_40 = arith.constant dense<0.000000e+00> : vector<2x16xf32>
    %36 = tpu.matmul %33, %35, %cst_40 {dimension_numbers = #tpu.dot_dimension_numbers<[1], [0], [0], [1], [0, 0, 1, 1], [], []>} : vector<2x16xf32>, vector<16x16xf32>, vector<2x16xf32> -> vector<2x16xf32>
    %c4_41 = arith.constant 4 : index
    %c0_42 = arith.constant 0 : index
    %c0_43 = arith.constant 0 : index
    %37 = vector.load %arg3[%c4_41, %c0_42, %c0_43] : memref<8x2x16xf32, #tpu.memory_space<vmem>>, vector<1x2x16xf32>
    %38 = vector.shape_cast %37 : vector<1x2x16xf32> to vector<2x16xf32>
    %39 = vector.shape_cast %36 : vector<2x16xf32> to vector<1x2x16xf32>
    tpu.vector_store %arg3[%c4_41, %c0_42, %c0_43], %39 {strides = array<i32>} : memref<8x2x16xf32, #tpu.memory_space<vmem>>, vector<1x2x16xf32>,
    %c5 = arith.constant 5 : index
    %c0_44 = arith.constant 0 : index
    %c0_45 = arith.constant 0 : index
    %40 = vector.load %arg1[%c5, %c0_44, %c0_45] : memref<8x2x16xf32, #tpu.memory_space<vmem>>, vector<1x2x16xf32>
    %41 = vector.shape_cast %40 : vector<1x2x16xf32> to vector<2x16xf32>
    %c5_46 = arith.constant 5 : index
    %c0_47 = arith.constant 0 : index
    %c0_48 = arith.constant 0 : index
    %42 = vector.load %arg2[%c5_46, %c0_47, %c0_48] : memref<8x16x16xf32, #tpu.memory_space<vmem>>, vector<1x16x16xf32>
    %43 = vector.shape_cast %42 : vector<1x16x16xf32> to vector<16x16xf32>
    %cst_49 = arith.constant dense<0.000000e+00> : vector<2x16xf32>
    %44 = tpu.matmul %41, %43, %cst_49 {dimension_numbers = #tpu.dot_dimension_numbers<[1], [0], [0], [1], [0, 0, 1, 1], [], []>} : vector<2x16xf32>, vector<16x16xf32>, vector<2x16xf32> -> vector<2x16xf32>
    %c5_50 = arith.constant 5 : index
    %c0_51 = arith.constant 0 : index
    %c0_52 = arith.constant 0 : index
    %45 = vector.load %arg3[%c5_50, %c0_51, %c0_52] : memref<8x2x16xf32, #tpu.memory_space<vmem>>, vector<1x2x16xf32>
    %46 = vector.shape_cast %45 : vector<1x2x16xf32> to vector<2x16xf32>
    %47 = vector.shape_cast %44 : vector<2x16xf32> to vector<1x2x16xf32>
    tpu.vector_store %arg3[%c5_50, %c0_51, %c0_52], %47 {strides = array<i32>} : memref<8x2x16xf32, #tpu.memory_space<vmem>>, vector<1x2x16xf32>,
    %c6 = arith.constant 6 : index
    %c0_53 = arith.constant 0 : index
    %c0_54 = arith.constant 0 : index
    %48 = vector.load %arg1[%c6, %c0_53, %c0_54] : memref<8x2x16xf32, #tpu.memory_space<vmem>>, vector<1x2x16xf32>
    %49 = vector.shape_cast %48 : vector<1x2x16xf32> to vector<2x16xf32>
    %c6_55 = arith.constant 6 : index
    %c0_56 = arith.constant 0 : index
    %c0_57 = arith.constant 0 : index
    %50 = vector.load %arg2[%c6_55, %c0_56, %c0_57] : memref<8x16x16xf32, #tpu.memory_space<vmem>>, vector<1x16x16xf32>
    %51 = vector.shape_cast %50 : vector<1x16x16xf32> to vector<16x16xf32>
    %cst_58 = arith.constant dense<0.000000e+00> : vector<2x16xf32>
    %52 = tpu.matmul %49, %51, %cst_58 {dimension_numbers = #tpu.dot_dimension_numbers<[1], [0], [0], [1], [0, 0, 1, 1], [], []>} : vector<2x16xf32>, vector<16x16xf32>, vector<2x16xf32> -> vector<2x16xf32>
    %c6_59 = arith.constant 6 : index
    %c0_60 = arith.constant 0 : index
    %c0_61 = arith.constant 0 : index
    %53 = vector.load %arg3[%c6_59, %c0_60, %c0_61] : memref<8x2x16xf32, #tpu.memory_space<vmem>>, vector<1x2x16xf32>
    %54 = vector.shape_cast %53 : vector<1x2x16xf32> to vector<2x16xf32>
    %55 = vector.shape_cast %52 : vector<2x16xf32> to vector<1x2x16xf32>
    tpu.vector_store %arg3[%c6_59, %c0_60, %c0_61], %55 {strides = array<i32>} : memref<8x2x16xf32, #tpu.memory_space<vmem>>, vector<1x2x16xf32>,
    %c7 = arith.constant 7 : index
    %c0_62 = arith.constant 0 : index
    %c0_63 = arith.constant 0 : index
    %56 = vector.load %arg1[%c7, %c0_62, %c0_63] : memref<8x2x16xf32, #tpu.memory_space<vmem>>, vector<1x2x16xf32>
    %57 = vector.shape_cast %56 : vector<1x2x16xf32> to vector<2x16xf32>
    %c7_64 = arith.constant 7 : index
    %c0_65 = arith.constant 0 : index
    %c0_66 = arith.constant 0 : index
    %58 = vector.load %arg2[%c7_64, %c0_65, %c0_66] : memref<8x16x16xf32, #tpu.memory_space<vmem>>, vector<1x16x16xf32>
    %59 = vector.shape_cast %58 : vector<1x16x16xf32> to vector<16x16xf32>
    %cst_67 = arith.constant dense<0.000000e+00> : vector<2x16xf32>
    %60 = tpu.matmul %57, %59, %cst_67 {dimension_numbers = #tpu.dot_dimension_numbers<[1], [0], [0], [1], [0, 0, 1, 1], [], []>} : vector<2x16xf32>, vector<16x16xf32>, vector<2x16xf32> -> vector<2x16xf32>
    %c7_68 = arith.constant 7 : index
    %c0_69 = arith.constant 0 : index
    %c0_70 = arith.constant 0 : index
    %61 = vector.load %arg3[%c7_68, %c0_69, %c0_70] : memref<8x2x16xf32, #tpu.memory_space<vmem>>, vector<1x2x16xf32>
    %62 = vector.shape_cast %61 : vector<1x2x16xf32> to vector<2x16xf32>
    %63 = vector.shape_cast %60 : vector<2x16xf32> to vector<1x2x16xf32>
    tpu.vector_store %arg3[%c7_68, %c0_69, %c0_70], %63 {strides = array<i32>} : memref<8x2x16xf32, #tpu.memory_space<vmem>>, vector<1x2x16xf32>,
    return
  }
  func.func @transform_0(%arg0: i32) -> (i32, i32, i32) {
    %c0_i32 = arith.constant 0 : i32
    %c0_i32_0 = arith.constant 0 : i32
    %c0_i32_1 = arith.constant 0 : i32
    return %arg0, %c0_i32, %c0_i32_0 : i32, i32, i32
  }
  func.func @transform_1(%arg0: i32) -> (i32, i32, i32) {
    %c0_i32 = arith.constant 0 : i32
    %c0_i32_0 = arith.constant 0 : i32
    %c0_i32_1 = arith.constant 0 : i32
    return %arg0, %c0_i32, %c0_i32_0 : i32, i32, i32
  }
  func.func @transform_2(%arg0: i32) -> (i32, i32, i32) {
    %c0_i32 = arith.constant 0 : i32
    %c0_i32_0 = arith.constant 0 : i32
    %c0_i32_1 = arith.constant 0 : i32
    return %arg0, %c0_i32, %c0_i32_0 : i32, i32, i32
  }
}

module attributes {stable_mosaic.version = 11 : i64} {
  func.func @_branch_layer_kernel(%arg0: i32, %arg1: i32, %arg2: memref<1x8x625xf32, #tpu.memory_space<vmem>>, %arg3: memref<1x8x625xf32, #tpu.memory_space<vmem>>, %arg4: memref<8x8xf32, #tpu.memory_space<vmem>>, %arg5: memref<8x1xf32, #tpu.memory_space<vmem>>, %arg6: memref<8x8xf32, #tpu.memory_space<vmem>>, %arg7: memref<8x1xf32, #tpu.memory_space<vmem>>, %arg8: memref<8x8xf32, #tpu.memory_space<vmem>>, %arg9: memref<8x1xf32, #tpu.memory_space<vmem>>, %arg10: memref<1x8x625xf32, #tpu.memory_space<vmem>>) attributes {dimension_semantics = [#tpu.dimension_semantics<parallel>, #tpu.dimension_semantics<parallel>], iteration_bounds = array<i64: 2, 1>, scalar_prefetch = 0 : i64, scratch_operands = 0 : i64, tpu.core_type = #tpu.core_type<tc>, window_params = [{transform_indices = @transform_0, window_bounds = array<i64: 1, 8, 625>}, {transform_indices = @transform_1, window_bounds = array<i64: 1, 8, 625>}, {pipeline_mode = #tpu.pipeline_mode<synchronous>, transform_indices = @transform_2, window_bounds = array<i64: 8, 8>}, {pipeline_mode = #tpu.pipeline_mode<synchronous>, transform_indices = @transform_3, window_bounds = array<i64: 8, 1>}, {pipeline_mode = #tpu.pipeline_mode<synchronous>, transform_indices = @transform_4, window_bounds = array<i64: 8, 8>}, {pipeline_mode = #tpu.pipeline_mode<synchronous>, transform_indices = @transform_5, window_bounds = array<i64: 8, 1>}, {pipeline_mode = #tpu.pipeline_mode<synchronous>, transform_indices = @transform_6, window_bounds = array<i64: 8, 8>}, {pipeline_mode = #tpu.pipeline_mode<synchronous>, transform_indices = @transform_7, window_bounds = array<i64: 8, 1>}, {transform_indices = @transform_8, window_bounds = array<i64: 1, 8, 625>}]} {
    %c0 = arith.constant 0 : index
    %c0_0 = arith.constant 0 : index
    %c0_1 = arith.constant 0 : index
    %0 = vector.load %arg2[%c0, %c0_0, %c0_1] : memref<1x8x625xf32, #tpu.memory_space<vmem>>, vector<1x8x625xf32>
    %1 = vector.shape_cast %0 : vector<1x8x625xf32> to vector<8x625xf32>
    %c0_2 = arith.constant 0 : index
    %c0_3 = arith.constant 0 : index
    %2 = vector.load %arg4[%c0_2, %c0_3] : memref<8x8xf32, #tpu.memory_space<vmem>>, vector<8x8xf32>
    %cst = arith.constant dense<0.000000e+00> : vector<8x625xf32>
    %3 = tpu.matmul %2, %1, %cst {dimension_numbers = #tpu.dot_dimension_numbers<[1], [0], [0], [1], [0, 0, 1, 1], [], []>} : vector<8x8xf32>, vector<8x625xf32>, vector<8x625xf32> -> vector<8x625xf32>
    %c0_4 = arith.constant 0 : index
    %c0_5 = arith.constant 0 : index
    %4 = vector.load %arg5[%c0_4, %c0_5] : memref<8x1xf32, #tpu.memory_space<vmem>>, vector<8x1xf32>
    %5 = vector.broadcast %4 : vector<8x1xf32> to vector<8x625xf32>
    %6 = arith.addf %3, %5 : vector<8x625xf32>
    %c0_6 = arith.constant 0 : index
    %c0_7 = arith.constant 0 : index
    %7 = vector.load %arg6[%c0_6, %c0_7] : memref<8x8xf32, #tpu.memory_space<vmem>>, vector<8x8xf32>
    %cst_8 = arith.constant dense<0.000000e+00> : vector<8x625xf32>
    %8 = tpu.matmul %7, %6, %cst_8 {dimension_numbers = #tpu.dot_dimension_numbers<[1], [0], [0], [1], [0, 0, 1, 1], [], []>} : vector<8x8xf32>, vector<8x625xf32>, vector<8x625xf32> -> vector<8x625xf32>
    %c0_9 = arith.constant 0 : index
    %c0_10 = arith.constant 0 : index
    %9 = vector.load %arg7[%c0_9, %c0_10] : memref<8x1xf32, #tpu.memory_space<vmem>>, vector<8x1xf32>
    %10 = vector.broadcast %9 : vector<8x1xf32> to vector<8x625xf32>
    %11 = arith.addf %8, %10 : vector<8x625xf32>
    %cst_11 = arith.constant 5.000000e-01 : f32
    %12 = vector.broadcast %cst_11 : f32 to vector<8x625xf32>
    %13 = arith.mulf %12, %11 : vector<8x625xf32>
    %cst_12 = arith.constant 0.707106769 : f32
    %14 = vector.broadcast %cst_12 : f32 to vector<8x625xf32>
    %15 = arith.mulf %11, %14 : vector<8x625xf32>
    %16 = math.erf %15 : vector<8x625xf32>
    %cst_13 = arith.constant 1.000000e+00 : f32
    %17 = vector.broadcast %cst_13 : f32 to vector<8x625xf32>
    %18 = arith.addf %17, %16 : vector<8x625xf32>
    %19 = arith.mulf %13, %18 : vector<8x625xf32>
    %c0_14 = arith.constant 0 : index
    %c0_15 = arith.constant 0 : index
    %20 = vector.load %arg8[%c0_14, %c0_15] : memref<8x8xf32, #tpu.memory_space<vmem>>, vector<8x8xf32>
    %cst_16 = arith.constant dense<0.000000e+00> : vector<8x625xf32>
    %21 = tpu.matmul %20, %19, %cst_16 {dimension_numbers = #tpu.dot_dimension_numbers<[1], [0], [0], [1], [0, 0, 1, 1], [], []>} : vector<8x8xf32>, vector<8x625xf32>, vector<8x625xf32> -> vector<8x625xf32>
    %c0_17 = arith.constant 0 : index
    %c0_18 = arith.constant 0 : index
    %22 = vector.load %arg9[%c0_17, %c0_18] : memref<8x1xf32, #tpu.memory_space<vmem>>, vector<8x1xf32>
    %23 = vector.broadcast %22 : vector<8x1xf32> to vector<8x625xf32>
    %24 = arith.addf %21, %23 : vector<8x625xf32>
    %c0_19 = arith.constant 0 : index
    %c0_20 = arith.constant 0 : index
    %c0_21 = arith.constant 0 : index
    %25 = vector.load %arg3[%c0_19, %c0_20, %c0_21] : memref<1x8x625xf32, #tpu.memory_space<vmem>>, vector<1x8x625xf32>
    %26 = vector.shape_cast %25 : vector<1x8x625xf32> to vector<8x625xf32>
    %27 = arith.addf %26, %24 : vector<8x625xf32>
    %cst_22 = arith.constant 5.000000e-01 : f32
    %28 = vector.broadcast %cst_22 : f32 to vector<8x625xf32>
    %29 = arith.mulf %28, %27 : vector<8x625xf32>
    %cst_23 = arith.constant 0.707106769 : f32
    %30 = vector.broadcast %cst_23 : f32 to vector<8x625xf32>
    %31 = arith.mulf %27, %30 : vector<8x625xf32>
    %32 = math.erf %31 : vector<8x625xf32>
    %cst_24 = arith.constant 1.000000e+00 : f32
    %33 = vector.broadcast %cst_24 : f32 to vector<8x625xf32>
    %34 = arith.addf %33, %32 : vector<8x625xf32>
    %35 = arith.mulf %29, %34 : vector<8x625xf32>
    %c0_25 = arith.constant 0 : index
    %c0_26 = arith.constant 0 : index
    %c0_27 = arith.constant 0 : index
    %36 = vector.load %arg10[%c0_25, %c0_26, %c0_27] : memref<1x8x625xf32, #tpu.memory_space<vmem>>, vector<1x8x625xf32>
    %37 = vector.shape_cast %36 : vector<1x8x625xf32> to vector<8x625xf32>
    %38 = vector.shape_cast %35 : vector<8x625xf32> to vector<1x8x625xf32>
    tpu.vector_store %arg10[%c0_25, %c0_26, %c0_27], %38 {strides = array<i32>} : memref<1x8x625xf32, #tpu.memory_space<vmem>>, vector<1x8x625xf32>,
    return
  }
  func.func @transform_0(%arg0: i32, %arg1: i32) -> (i32, i32, i32) {
    %c0_i32 = arith.constant 0 : i32
    %c0_i32_0 = arith.constant 0 : i32
    return %arg0, %c0_i32, %arg1 : i32, i32, i32
  }
  func.func @transform_1(%arg0: i32, %arg1: i32) -> (i32, i32, i32) {
    %c0_i32 = arith.constant 0 : i32
    %c0_i32_0 = arith.constant 0 : i32
    return %arg0, %c0_i32, %arg1 : i32, i32, i32
  }
  func.func @transform_2(%arg0: i32, %arg1: i32) -> (i32, i32) {
    %c0_i32 = arith.constant 0 : i32
    %c0_i32_0 = arith.constant 0 : i32
    %c0_i32_1 = arith.constant 0 : i32
    return %c0_i32, %c0_i32_0 : i32, i32
  }
  func.func @transform_3(%arg0: i32, %arg1: i32) -> (i32, i32) {
    %c0_i32 = arith.constant 0 : i32
    %c0_i32_0 = arith.constant 0 : i32
    %c0_i32_1 = arith.constant 0 : i32
    return %c0_i32, %c0_i32_0 : i32, i32
  }
  func.func @transform_4(%arg0: i32, %arg1: i32) -> (i32, i32) {
    %c0_i32 = arith.constant 0 : i32
    %c0_i32_0 = arith.constant 0 : i32
    %c0_i32_1 = arith.constant 0 : i32
    return %c0_i32, %c0_i32_0 : i32, i32
  }
  func.func @transform_5(%arg0: i32, %arg1: i32) -> (i32, i32) {
    %c0_i32 = arith.constant 0 : i32
    %c0_i32_0 = arith.constant 0 : i32
    %c0_i32_1 = arith.constant 0 : i32
    return %c0_i32, %c0_i32_0 : i32, i32
  }
  func.func @transform_6(%arg0: i32, %arg1: i32) -> (i32, i32) {
    %c0_i32 = arith.constant 0 : i32
    %c0_i32_0 = arith.constant 0 : i32
    %c0_i32_1 = arith.constant 0 : i32
    return %c0_i32, %c0_i32_0 : i32, i32
  }
  func.func @transform_7(%arg0: i32, %arg1: i32) -> (i32, i32) {
    %c0_i32 = arith.constant 0 : i32
    %c0_i32_0 = arith.constant 0 : i32
    %c0_i32_1 = arith.constant 0 : i32
    return %c0_i32, %c0_i32_0 : i32, i32
  }
  func.func @transform_8(%arg0: i32, %arg1: i32) -> (i32, i32, i32) {
    %c0_i32 = arith.constant 0 : i32
    %c0_i32_0 = arith.constant 0 : i32
    return %arg0, %c0_i32, %arg1 : i32, i32, i32
  }
}

module attributes {stable_mosaic.version = 11 : i64} {
  func.func @_branch_layer_kernel(%arg0: i32, %arg1: i32, %arg2: memref<1x8x625xf32, #tpu.memory_space<vmem>>, %arg3: memref<1x8x625xf32, #tpu.memory_space<vmem>>, %arg4: memref<8x8xf32, #tpu.memory_space<vmem>>, %arg5: memref<8x1xf32, #tpu.memory_space<vmem>>, %arg6: memref<8x8xf32, #tpu.memory_space<vmem>>, %arg7: memref<8x1xf32, #tpu.memory_space<vmem>>, %arg8: memref<8x8xf32, #tpu.memory_space<vmem>>, %arg9: memref<8x1xf32, #tpu.memory_space<vmem>>, %arg10: memref<1x8x625xf32, #tpu.memory_space<vmem>>) attributes {dimension_semantics = [#tpu.dimension_semantics<parallel>, #tpu.dimension_semantics<parallel>], iteration_bounds = array<i64: 2, 1>, scalar_prefetch = 0 : i64, scratch_operands = 0 : i64, tpu.core_type = #tpu.core_type<tc>, window_params = [{transform_indices = @transform_0, window_bounds = array<i64: 1, 8, 625>}, {transform_indices = @transform_1, window_bounds = array<i64: 1, 8, 625>}, {pipeline_mode = #tpu.pipeline_mode<synchronous>, transform_indices = @transform_2, window_bounds = array<i64: 8, 8>}, {pipeline_mode = #tpu.pipeline_mode<synchronous>, transform_indices = @transform_3, window_bounds = array<i64: 8, 1>}, {pipeline_mode = #tpu.pipeline_mode<synchronous>, transform_indices = @transform_4, window_bounds = array<i64: 8, 8>}, {pipeline_mode = #tpu.pipeline_mode<synchronous>, transform_indices = @transform_5, window_bounds = array<i64: 8, 1>}, {pipeline_mode = #tpu.pipeline_mode<synchronous>, transform_indices = @transform_6, window_bounds = array<i64: 8, 8>}, {pipeline_mode = #tpu.pipeline_mode<synchronous>, transform_indices = @transform_7, window_bounds = array<i64: 8, 1>}, {transform_indices = @transform_8, window_bounds = array<i64: 1, 8, 625>}]} {
    %c0 = arith.constant 0 : index
    %c0_0 = arith.constant 0 : index
    %c0_1 = arith.constant 0 : index
    %0 = vector.load %arg2[%c0, %c0_0, %c0_1] : memref<1x8x625xf32, #tpu.memory_space<vmem>>, vector<1x8x625xf32>
    %1 = vector.shape_cast %0 : vector<1x8x625xf32> to vector<8x625xf32>
    %c0_2 = arith.constant 0 : index
    %c0_3 = arith.constant 0 : index
    %2 = vector.load %arg4[%c0_2, %c0_3] : memref<8x8xf32, #tpu.memory_space<vmem>>, vector<8x8xf32>
    %cst = arith.constant dense<0.000000e+00> : vector<8x625xf32>
    %3 = tpu.matmul %2, %1, %cst {dimension_numbers = #tpu.dot_dimension_numbers<[1], [0], [0], [1], [0, 0, 1, 1], [], []>} : vector<8x8xf32>, vector<8x625xf32>, vector<8x625xf32> -> vector<8x625xf32>
    %c0_4 = arith.constant 0 : index
    %c0_5 = arith.constant 0 : index
    %4 = vector.load %arg5[%c0_4, %c0_5] : memref<8x1xf32, #tpu.memory_space<vmem>>, vector<8x1xf32>
    %5 = vector.broadcast %4 : vector<8x1xf32> to vector<8x625xf32>
    %6 = arith.addf %3, %5 : vector<8x625xf32>
    %c0_6 = arith.constant 0 : index
    %c0_7 = arith.constant 0 : index
    %7 = vector.load %arg6[%c0_6, %c0_7] : memref<8x8xf32, #tpu.memory_space<vmem>>, vector<8x8xf32>
    %cst_8 = arith.constant dense<0.000000e+00> : vector<8x625xf32>
    %8 = tpu.matmul %7, %6, %cst_8 {dimension_numbers = #tpu.dot_dimension_numbers<[1], [0], [0], [1], [0, 0, 1, 1], [], []>} : vector<8x8xf32>, vector<8x625xf32>, vector<8x625xf32> -> vector<8x625xf32>
    %c0_9 = arith.constant 0 : index
    %c0_10 = arith.constant 0 : index
    %9 = vector.load %arg7[%c0_9, %c0_10] : memref<8x1xf32, #tpu.memory_space<vmem>>, vector<8x1xf32>
    %10 = vector.broadcast %9 : vector<8x1xf32> to vector<8x625xf32>
    %11 = arith.addf %8, %10 : vector<8x625xf32>
    %cst_11 = arith.constant 5.000000e-01 : f32
    %12 = vector.broadcast %cst_11 : f32 to vector<8x625xf32>
    %13 = arith.mulf %12, %11 : vector<8x625xf32>
    %cst_12 = arith.constant 0.707106769 : f32
    %14 = vector.broadcast %cst_12 : f32 to vector<8x625xf32>
    %15 = arith.mulf %11, %14 : vector<8x625xf32>
    %16 = math.erf %15 : vector<8x625xf32>
    %cst_13 = arith.constant 1.000000e+00 : f32
    %17 = vector.broadcast %cst_13 : f32 to vector<8x625xf32>
    %18 = arith.addf %17, %16 : vector<8x625xf32>
    %19 = arith.mulf %13, %18 : vector<8x625xf32>
    %c0_14 = arith.constant 0 : index
    %c0_15 = arith.constant 0 : index
    %20 = vector.load %arg8[%c0_14, %c0_15] : memref<8x8xf32, #tpu.memory_space<vmem>>, vector<8x8xf32>
    %cst_16 = arith.constant dense<0.000000e+00> : vector<8x625xf32>
    %21 = tpu.matmul %20, %19, %cst_16 {dimension_numbers = #tpu.dot_dimension_numbers<[1], [0], [0], [1], [0, 0, 1, 1], [], []>} : vector<8x8xf32>, vector<8x625xf32>, vector<8x625xf32> -> vector<8x625xf32>
    %c0_17 = arith.constant 0 : index
    %c0_18 = arith.constant 0 : index
    %22 = vector.load %arg9[%c0_17, %c0_18] : memref<8x1xf32, #tpu.memory_space<vmem>>, vector<8x1xf32>
    %23 = vector.broadcast %22 : vector<8x1xf32> to vector<8x625xf32>
    %24 = arith.addf %21, %23 : vector<8x625xf32>
    %c0_19 = arith.constant 0 : index
    %c0_20 = arith.constant 0 : index
    %c0_21 = arith.constant 0 : index
    %25 = vector.load %arg3[%c0_19, %c0_20, %c0_21] : memref<1x8x625xf32, #tpu.memory_space<vmem>>, vector<1x8x625xf32>
    %26 = vector.shape_cast %25 : vector<1x8x625xf32> to vector<8x625xf32>
    %27 = arith.addf %26, %24 : vector<8x625xf32>
    %c0_22 = arith.constant 0 : index
    %c0_23 = arith.constant 0 : index
    %c0_24 = arith.constant 0 : index
    %28 = vector.load %arg10[%c0_22, %c0_23, %c0_24] : memref<1x8x625xf32, #tpu.memory_space<vmem>>, vector<1x8x625xf32>
    %29 = vector.shape_cast %28 : vector<1x8x625xf32> to vector<8x625xf32>
    %30 = vector.shape_cast %27 : vector<8x625xf32> to vector<1x8x625xf32>
    tpu.vector_store %arg10[%c0_22, %c0_23, %c0_24], %30 {strides = array<i32>} : memref<1x8x625xf32, #tpu.memory_space<vmem>>, vector<1x8x625xf32>,
    return
  }
  func.func @transform_0(%arg0: i32, %arg1: i32) -> (i32, i32, i32) {
    %c0_i32 = arith.constant 0 : i32
    %c0_i32_0 = arith.constant 0 : i32
    return %arg0, %c0_i32, %arg1 : i32, i32, i32
  }
  func.func @transform_1(%arg0: i32, %arg1: i32) -> (i32, i32, i32) {
    %c0_i32 = arith.constant 0 : i32
    %c0_i32_0 = arith.constant 0 : i32
    return %arg0, %c0_i32, %arg1 : i32, i32, i32
  }
  func.func @transform_2(%arg0: i32, %arg1: i32) -> (i32, i32) {
    %c0_i32 = arith.constant 0 : i32
    %c0_i32_0 = arith.constant 0 : i32
    %c0_i32_1 = arith.constant 0 : i32
    return %c0_i32, %c0_i32_0 : i32, i32
  }
  func.func @transform_3(%arg0: i32, %arg1: i32) -> (i32, i32) {
    %c0_i32 = arith.constant 0 : i32
    %c0_i32_0 = arith.constant 0 : i32
    %c0_i32_1 = arith.constant 0 : i32
    return %c0_i32, %c0_i32_0 : i32, i32
  }
  func.func @transform_4(%arg0: i32, %arg1: i32) -> (i32, i32) {
    %c0_i32 = arith.constant 0 : i32
    %c0_i32_0 = arith.constant 0 : i32
    %c0_i32_1 = arith.constant 0 : i32
    return %c0_i32, %c0_i32_0 : i32, i32
  }
  func.func @transform_5(%arg0: i32, %arg1: i32) -> (i32, i32) {
    %c0_i32 = arith.constant 0 : i32
    %c0_i32_0 = arith.constant 0 : i32
    %c0_i32_1 = arith.constant 0 : i32
    return %c0_i32, %c0_i32_0 : i32, i32
  }
  func.func @transform_6(%arg0: i32, %arg1: i32) -> (i32, i32) {
    %c0_i32 = arith.constant 0 : i32
    %c0_i32_0 = arith.constant 0 : i32
    %c0_i32_1 = arith.constant 0 : i32
    return %c0_i32, %c0_i32_0 : i32, i32
  }
  func.func @transform_7(%arg0: i32, %arg1: i32) -> (i32, i32) {
    %c0_i32 = arith.constant 0 : i32
    %c0_i32_0 = arith.constant 0 : i32
    %c0_i32_1 = arith.constant 0 : i32
    return %c0_i32, %c0_i32_0 : i32, i32
  }
  func.func @transform_8(%arg0: i32, %arg1: i32) -> (i32, i32, i32) {
    %c0_i32 = arith.constant 0 : i32
    %c0_i32_0 = arith.constant 0 : i32
    return %arg0, %c0_i32, %arg1 : i32, i32, i32
  }
}

module attributes {stable_mosaic.version = 11 : i64} {
  func.func @_outproj_kernel(%arg0: i32, %arg1: i32, %arg2: memref<1x8x256xf32, #tpu.memory_space<vmem>>, %arg3: memref<8x8xf32, #tpu.memory_space<vmem>>, %arg4: memref<8x1xf32, #tpu.memory_space<vmem>>, %arg5: memref<1x8xf32, #tpu.memory_space<vmem>>, %arg6: memref<1x1xf32, #tpu.memory_space<vmem>>, %arg7: memref<1x1x256xf32, #tpu.memory_space<vmem>>) attributes {dimension_semantics = [#tpu.dimension_semantics<parallel>, #tpu.dimension_semantics<parallel>], iteration_bounds = array<i64: 2, 1>, scalar_prefetch = 0 : i64, scratch_operands = 0 : i64, tpu.core_type = #tpu.core_type<tc>, window_params = [{transform_indices = @transform_0, window_bounds = array<i64: 1, 8, 256>}, {pipeline_mode = #tpu.pipeline_mode<synchronous>, transform_indices = @transform_1, window_bounds = array<i64: 8, 8>}, {pipeline_mode = #tpu.pipeline_mode<synchronous>, transform_indices = @transform_2, window_bounds = array<i64: 8, 1>}, {pipeline_mode = #tpu.pipeline_mode<synchronous>, transform_indices = @transform_3, window_bounds = array<i64: 1, 8>}, {pipeline_mode = #tpu.pipeline_mode<synchronous>, transform_indices = @transform_4, window_bounds = array<i64: 1, 1>}, {transform_indices = @transform_5, window_bounds = array<i64: 1, 1, 256>}]} {
    %c0 = arith.constant 0 : index
    %c0_0 = arith.constant 0 : index
    %0 = vector.load %arg3[%c0, %c0_0] : memref<8x8xf32, #tpu.memory_space<vmem>>, vector<8x8xf32>
    %c0_1 = arith.constant 0 : index
    %c0_2 = arith.constant 0 : index
    %c0_3 = arith.constant 0 : index
    %1 = vector.load %arg2[%c0_1, %c0_2, %c0_3] : memref<1x8x256xf32, #tpu.memory_space<vmem>>, vector<1x8x256xf32>
    %2 = vector.shape_cast %1 : vector<1x8x256xf32> to vector<8x256xf32>
    %cst = arith.constant dense<0.000000e+00> : vector<8x256xf32>
    %3 = tpu.matmul %0, %2, %cst {dimension_numbers = #tpu.dot_dimension_numbers<[1], [0], [0], [1], [0, 0, 1, 1], [], []>} : vector<8x8xf32>, vector<8x256xf32>, vector<8x256xf32> -> vector<8x256xf32>
    %c0_4 = arith.constant 0 : index
    %c0_5 = arith.constant 0 : index
    %4 = vector.load %arg4[%c0_4, %c0_5] : memref<8x1xf32, #tpu.memory_space<vmem>>, vector<8x1xf32>
    %5 = vector.broadcast %4 : vector<8x1xf32> to vector<8x256xf32>
    %6 = arith.addf %3, %5 : vector<8x256xf32>
    %cst_6 = arith.constant 5.000000e-01 : f32
    %7 = vector.broadcast %cst_6 : f32 to vector<8x256xf32>
    %8 = arith.mulf %7, %6 : vector<8x256xf32>
    %cst_7 = arith.constant 0.707106769 : f32
    %9 = vector.broadcast %cst_7 : f32 to vector<8x256xf32>
    %10 = arith.mulf %6, %9 : vector<8x256xf32>
    %11 = math.erf %10 : vector<8x256xf32>
    %cst_8 = arith.constant 1.000000e+00 : f32
    %12 = vector.broadcast %cst_8 : f32 to vector<8x256xf32>
    %13 = arith.addf %12, %11 : vector<8x256xf32>
    %14 = arith.mulf %8, %13 : vector<8x256xf32>
    %c0_9 = arith.constant 0 : index
    %c0_10 = arith.constant 0 : index
    %15 = vector.load %arg5[%c0_9, %c0_10] : memref<1x8xf32, #tpu.memory_space<vmem>>, vector<1x8xf32>
    %cst_11 = arith.constant dense<0.000000e+00> : vector<1x256xf32>
    %16 = tpu.matmul %15, %14, %cst_11 {dimension_numbers = #tpu.dot_dimension_numbers<[1], [0], [0], [1], [0, 0, 1, 1], [], []>} : vector<1x8xf32>, vector<8x256xf32>, vector<1x256xf32> -> vector<1x256xf32>
    %c0_12 = arith.constant 0 : index
    %c0_13 = arith.constant 0 : index
    %17 = vector.load %arg6[%c0_12, %c0_13] : memref<1x1xf32, #tpu.memory_space<vmem>>, vector<1x1xf32>
    %18 = vector.broadcast %17 : vector<1x1xf32> to vector<1x256xf32>
    %19 = arith.addf %16, %18 : vector<1x256xf32>
    %c0_14 = arith.constant 0 : index
    %c0_15 = arith.constant 0 : index
    %c0_16 = arith.constant 0 : index
    %20 = vector.load %arg7[%c0_14, %c0_15, %c0_16] : memref<1x1x256xf32, #tpu.memory_space<vmem>>, vector<1x1x256xf32>
    %21 = vector.shape_cast %20 : vector<1x1x256xf32> to vector<1x256xf32>
    %22 = vector.shape_cast %19 : vector<1x256xf32> to vector<1x1x256xf32>
    tpu.vector_store %arg7[%c0_14, %c0_15, %c0_16], %22 {strides = array<i32>} : memref<1x1x256xf32, #tpu.memory_space<vmem>>, vector<1x1x256xf32>,
    return
  }
  func.func @transform_0(%arg0: i32, %arg1: i32) -> (i32, i32, i32) {
    %c0_i32 = arith.constant 0 : i32
    %c0_i32_0 = arith.constant 0 : i32
    return %arg0, %c0_i32, %arg1 : i32, i32, i32
  }
  func.func @transform_1(%arg0: i32, %arg1: i32) -> (i32, i32) {
    %c0_i32 = arith.constant 0 : i32
    %c0_i32_0 = arith.constant 0 : i32
    %c0_i32_1 = arith.constant 0 : i32
    return %c0_i32, %c0_i32_0 : i32, i32
  }
  func.func @transform_2(%arg0: i32, %arg1: i32) -> (i32, i32) {
    %c0_i32 = arith.constant 0 : i32
    %c0_i32_0 = arith.constant 0 : i32
    %c0_i32_1 = arith.constant 0 : i32
    return %c0_i32, %c0_i32_0 : i32, i32
  }
  func.func @transform_3(%arg0: i32, %arg1: i32) -> (i32, i32) {
    %c0_i32 = arith.constant 0 : i32
    %c0_i32_0 = arith.constant 0 : i32
    %c0_i32_1 = arith.constant 0 : i32
    return %c0_i32, %c0_i32_0 : i32, i32
  }
  func.func @transform_4(%arg0: i32, %arg1: i32) -> (i32, i32) {
    %c0_i32 = arith.constant 0 : i32
    %c0_i32_0 = arith.constant 0 : i32
    %c0_i32_1 = arith.constant 0 : i32
    return %c0_i32, %c0_i32_0 : i32, i32
  }
  func.func @transform_5(%arg0: i32, %arg1: i32) -> (i32, i32, i32) {
    %c0_i32 = arith.constant 0 : i32
    %c0_i32_0 = arith.constant 0 : i32
    return %arg0, %c0_i32, %arg1 : i32, i32, i32
  }
}

</mosaic_0001>

<bundles_post_ra>
// kernel: _lambda_.7
= control target key start
LH: loop header
LB: loop body
LE: loop exit
PB: predicated region body
PF: predicated region fallthrough
CT: control target
= control target key end

     0   :  { %vm27_vm0 = vcmask 1043456   ;;  %vm23_vm1 = vcmask 31744   ;;  %v119_v0 = vmov 0.0   ;;  %vm120_vm2 = vmmov 0   ;;  %s153_s1 = inlined_call_operand.vmem [shape: f32[4,8], index: 1, kind: input, shape index: {}]   ;;  %s154_s0 = inlined_call_operand.vmem [shape: f32[2,4], index: 0, kind: input, shape index: {}]   ;;  %s155_s2 = inlined_call_operand.vmem [shape: f32[1,8], index: 2, kind: input, shape index: {}]   ;;  %s156_s3 = inlined_call_operand.vmem [shape: f32[2,8], index: 3, kind: output, shape index: {}]  }
   0x1   :  { %112 = vmatprep.subr.mxu0 %v119_v0  ;;  %v15_v1 = vld [vmem:[%s153_s1] sm:$0xf]  ;;  %114 = vmatprep.mubr.msk.f32.mxu0 %vm120_vm2, %v119_v0  ;;  %vm101_vm3 = vcmask 58368  }
   0x2   :  { %v14_v2 = vld [vmem:[%s154_s0] sm:$0x3]  ;;  %113 = vmatpush3.msk.msra.mxu0 %vm27_vm0, %v15_v1 }
   0x3   :  { %115 = vmatmul.mubr.msk.f32.vlgmr.msra.gmra.mrb[0].mxu0 %vm23_vm1, %v14_v2  ;;  %v107_v3 = vld [vmem:[%s155_s2] ss:$0 sm:$0xff] }
  0xd6   :  { %v97_v4 = vpop.f32.mrb[0].mxu0 }
  0xd7   :  { %v98_v5 = vadd.f32 %v107_v3, %v97_v4  ;;  %v116_v6 = vpop.f32.mrb[1].mxu0 }
  0xd9   :  { %102 = vst.msk [vmem:[%s156_s3] sm:$0x3] %vm101_vm3, %v98_v5 }

// kernel: _lambda_.8
= control target key start
LH: loop header
LB: loop body
LE: loop exit
PB: predicated region body
PF: predicated region fallthrough
CT: control target
= control target key end

     0   :  { %s549_s15 = smov 0   ;;  %s551_s16 = smov 0   ;;  %s591_s0 = inlined_call_operand.vmem [shape: f32[2,3,256], index: 0, kind: input, shape index: {}]   ;;  %s592_s1 = inlined_call_operand.vmem [shape: f32[2,8,1], index: 1, kind: input, shape index: {}]   ;;  %s593_s2 = inlined_call_operand.vmem [shape: f32[8,3], index: 2, kind: input, shape index: {}]   ;;  %s594_s3 = inlined_call_operand.vmem [shape: f32[8,1], index: 3, kind: input, shape index: {}]   ;;  %s595_s4 = inlined_call_operand.vmem [shape: f32[2,8,256], index: 4, kind: output, shape index: {}]  }
   0x1   :  { %s553_s17 = smov 0  }
   0x2 LB: > { %s26_s18 = sadd.s32 1, %s516_s16  ;;  %p457_p0 = scmp.ge.s32.totalorder %s520_s17, 1  ;;  %s520_s17 = sphi %s553_s17, %s14_s17   ;;  %s516_s16 = sphi %s551_s16, %s597_s16   ;;  %s512_s15 = sphi %s549_s15, %s596_s15  }
   0x3   : > { %p28_p1 = scmp.ge.s32.totalorder %s26_s18, 2  ;;  %p192_p2 = scmp.lt.s32.totalorder %s520_s17, 3 }
   0x5   : > { %s599_s18 = smov (%p28_p1, %s26_s18), 0  ;;  %p193_p3 = pnand %p457_p0, %p192_p2 }
   0x6   : > { %p231_p4 = scmp.lt.s32.totalorder (!%p193_p3), %s512_s15, 1  ;;  %v522_v0 = vmov (!%p193_p3), 0.0   ;;  %v523_v1 = vmov (!%p193_p3), 0   ;;  %v256_v2 = vld [vmem:[%s594_s3] sm:$0xff] (!%p193_p3)  ;;  %vm268_vm0 = vcmask (!%p193_p3), 1042432   ;;  %vm264_vm1 = vcmask (!%p193_p3), 23552  }
   0x7   : > { %196 = sbr.rel (%p193_p3) target bundleno = 240 (0xf0), region = 36  ;;  %337 = vmatprep.mubr.f32.mxu0 (!%p193_p3), %v522_v0  ;;  %496 = vset.pattern.permute.xlu0 (!%p193_p3), %v523_v1  ;;  %v254_v6 = vld [vmem:[%s593_s2] sm:$0xff] (!%p193_p3) }
   0x8   : > { %259 = vperm.xlu0 (!%p193_p3), %496, %v256_v2  }
   0xe   : > { %s601_s15 = smov (!%p231_p4, %s512_s15), 1 }
   0xf   : > { %s468_s21 = sshll.u32 %s601_s15, 3  ;;  %s469_s30 = sshll.u32 %s601_s15, 4 }
  0x10   : > { %s238_s24 = scalar_lea.vmem %s591_s0, %s468_s21  ;;  %s243_s27 = scalar_lea.vmem %s592_s1, %s468_s21 }
  0x11   : > { %v255_v3 = vld [vmem:[%s238_s24] sm:$0x77]  ;;  %s252_s7 = scalar_lea.vmem %s595_s4, %s469_s30 }
  0x12   : > { %v344_v4 = vld [vmem:[%s243_s27] sm:$0xff]  ;;  %v263_v5 = vcombine.high %v255_v3, %v255_v3 }
  0x13   : > { %347 = vperm.xlu0 %496, %v344_v4  }
  0x14   : > { %463 = vmatprep.subr.msk.mxu0 %vm268_vm0, %v263_v5 }
  0x15   : > { %464 = vmatpush1.msk.msra.mxu0 %vm268_vm0, %v255_v3 }
  0x16   : > { %465 = vmatmul.mubr.msk.f32.vlgmr.msra.gmra.mrb[0].mxu0 %vm264_vm1, %v254_v6 }
  0x87   : > { %v260_v7 = vpop.permute.xlu0 %259 }
  0x92   : > { %v348_v11 = vpop.permute.xlu0 %347 }
  0xe9   : > { %v339_v8 = vpop.f32.mrb[0].mxu0 }
  0xea   : > { %v340_v9 = vadd.f32 %v339_v8, %v260_v7  ;;  %v341_v10 = vpop.f32.mrb[1].mxu0 }
  0xeb   : > { %v342_v12 = vadd.f32 %v341_v10, %v260_v7 }
  0xec   : > { %v350_v13 = vmul.f32 %v348_v11, %v340_v9 }
  0xed   : > { %v351_v14 = vmul.f32 %v348_v11, %v342_v12 }
  0xee   : > { %352 = vst [vmem:[%s252_s7] sm:$0xff] %v350_v13 }
  0xef   : > { %353 = vst [vmem:[%s252_s7 + $0x8] sm:$0xff] %v351_v14 }
  0xf0 PF: > { %s14_s17 = sadd.s32 1, %s520_s17   ;;  %s596_s15 = smov %s516_s16 }
  0xf1   : > { %p11_p5 = scmp.ge.s32.totalorder %s14_s17, 4   ;;  %s597_s16 = smov %s599_s18 }
  0xf3   :  { %13 = sbr.rel (!%p11_p5) target bundleno = 2 (0x2), region = 69 }

// kernel: _lambda_.9
= control target key start
LH: loop header
LB: loop body
LE: loop exit
PB: predicated region body
PF: predicated region fallthrough
CT: control target
= control target key end

     0   :  { %s1071_s9 = smov 0   ;;  %s1167_s0 = inlined_call_operand.vmem [shape: f32[32,2,16], index: 0, kind: input, shape index: {}]   ;;  %s1168_s1 = inlined_call_operand.vmem [shape: f32[32,16,16], index: 1, kind: input, shape index: {}]   ;;  %s1169_s2 = inlined_call_operand.vmem [shape: f32[32,2,16], index: 2, kind: output, shape index: {}]  }
   0x1 LB: > { %s879_s10 = sadd.s32 4294967295, %s1051_s9   ;;  %p883_p0 = scmp.ge.s32.totalorder %s1051_s9, 1  ;;  %s1051_s9 = sphi %s1071_s9, %s12_s9  }
   0x2   : > { %p125_p1 = scmp.lt.s32.totalorder %s1051_s9, 5 }
   0x4   : > { %p126_p2 = pnand %p883_p0, %p125_p1 }
   0x5   : > { %s884_s11 = sshll.u32 (!%p126_p2), %s879_s10, 3  ;;  %v1053_v0 = vmov (!%p126_p2), 0.0|0.0   ;;  %vm1054_vm0 = vmmov (!%p126_p2), 0   ;;  %v1055_v1 = vmov (!%p126_p2), 0.0   ;;  %vm175_vm1 = vcmask (!%p126_p2), 130048  }
   0x6   : > { %129 = sbr.rel (%p126_p2) target bundleno = 248 (0xf8), region = 28  ;;  %1010 = vmatprep.subr.bf16.mxu0 (!%p126_p2), %v1053_v0  ;;  %1013 = vmatprep.subr.bf16.mxu1 (!%p126_p2), %v1053_v0  ;;  %p154_p3 = scmp.lt.s32.totalorder (!%p126_p2), %s884_s11, 31  ;;  %vm249_vm2 = vcmask (!%p126_p2), 123904  }
   0x7   : > { %958 = vmatprep.mubr.msk.f32.mxu0 (!%p126_p2), %vm1054_vm0, %v1055_v1  ;;  %965 = vmatprep.mubr.msk.f32.mxu1 (!%p126_p2), %vm1054_vm0, %v1055_v1 }
   0xd   : > { %s1171_s11 = smov (!%p154_p3, %s884_s11), 31 }
   0xe   : > { %s929_s12 = sshll.u32 %s1171_s11, 4  ;;  %s885_s13 = sshll.u32 %s1171_s11, 1 }
   0xf   : > { %s1092_s16 = scalar_lea.vmem %s1168_s1, %s929_s12  ;;  %s1102_s19 = scalar_lea.vmem %s1167_s0, %s885_s13 }
  0x10   : > { %v173_v2 = vld [vmem:[%s1092_s16] sm:$0xff]  ;;  %v174_v3 = vld [vmem:[%s1092_s16 + $0x8] sm:$0xff]  ;;  %v893_v4 = vld [vmem:[%s1092_s16 + $0x10] sm:$0xff]  ;;  %s170_s22 = scalar_lea.vmem %s1169_s2, %s885_s13 }
  0x11   : > { %v1011_v5 = vpack.c.bf16 %v174_v3, %v173_v2  ;;  %v894_v6 = vld [vmem:[%s1092_s16 + $0x18] sm:$0xff]  ;;  %v898_v8 = vld [vmem:[%s1092_s16 + $0x20] sm:$0xff]  ;;  %v899_v9 = vld [vmem:[%s1092_s16 + $0x28] sm:$0xff] }
  0x12   : > { %v1014_v7 = vpack.c.bf16 %v894_v6, %v893_v4  ;;  %v903_v10 = vld [vmem:[%s1092_s16 + $0x30] sm:$0xff]  ;;  %v172_v11 = vld [vmem:[%s1102_s19] sm:$0x3]  ;;  %v1017_v12 = vpack.c.bf16 %v899_v9, %v898_v8  ;;  %v904_v13 = vld [vmem:[%s1092_s16 + $0x38] sm:$0xff] }
  0x13   : > { %1012 = vmatpush3.bf16.msra.mxu0 %v1011_v5  ;;  %v892_v14 = vld [vmem:[%s1102_s19 + $0x2] sm:$0x3]  ;;  %v1020_v15 = vpack.c.bf16 %v904_v13, %v903_v10  ;;  %v909_v17 = vld [vmem:[%s1092_s16 + $0x48] sm:$0xff]  ;;  %v913_v18 = vld [vmem:[%s1092_s16 + $0x50] sm:$0xff] }
  0x14   : > { %1015 = vmatpush3.bf16.msra.mxu1 %v1014_v7  ;;  %1016 = vmatprep.subr.bf16.mxu0 %v1053_v0  ;;  %v908_v16 = vld [vmem:[%s1092_s16 + $0x40] sm:$0xff]  ;;  %v914_v19 = vld [vmem:[%s1092_s16 + $0x58] sm:$0xff]  ;;  %v919_v25 = vld [vmem:[%s1092_s16 + $0x68] sm:$0xff] }
  0x15   : > { %1019 = vmatprep.subr.bf16.mxu1 %v1053_v0  ;;  %v897_v20 = vld [vmem:[%s1102_s19 + $0x4] sm:$0x3]  ;;  %v1023_v21 = vpack.c.bf16 %v909_v17, %v908_v16  ;;  %v902_v22 = vld [vmem:[%s1102_s19 + $0x6] sm:$0x3]  ;;  %v1026_v23 = vpack.c.bf16 %v914_v19, %v913_v18  ;;  %v923_v26 = vld [vmem:[%s1092_s16 + $0x70] sm:$0xff] }
  0x16   : > { %959 = vmatmul.mubr.msk.f32.vlgmr.msra.gmra.mrb[0].mxu0 %vm175_vm1, %v172_v11  ;;  %v918_v24 = vld [vmem:[%s1092_s16 + $0x60] sm:$0xff]  ;;  %v924_v27 = vld [vmem:[%s1092_s16 + $0x78] sm:$0xff]  ;;  %v907_v28 = vld [vmem:[%s1102_s19 + $0x8] sm:$0x3] }
  0x17   : > { %966 = vmatmul.mubr.msk.f32.vlgmr.msra.gmra.mrb[0].mxu1 %vm175_vm1, %v892_v14  ;;  %1018 = vmatpush3.bf16.msra.mxu0 %v1017_v12  ;;  %v1029_v29 = vpack.c.bf16 %v919_v25, %v918_v24  ;;  %v912_v30 = vld [vmem:[%s1102_s19 + $0xa] sm:$0x3]  ;;  %v1032_v31 = vpack.c.bf16 %v924_v27, %v923_v26  ;;  %v917_v32 = vld [vmem:[%s1102_s19 + $0xc] sm:$0x3]  ;;  %v922_v33 = vld [vmem:[%s1102_s19 + $0xe] sm:$0x3] }
  0x18   : > { %1021 = vmatpush3.bf16.msra.mxu1 %v1020_v15  ;;  %972 = vmatprep.mubr.msk.f32.mxu0 %vm1054_vm0, %v1055_v1 }
  0x19   : > { %979 = vmatprep.mubr.msk.f32.mxu1 %vm1054_vm0, %v1055_v1  ;;  %1022 = vmatprep.subr.bf16.mxu0 %v1053_v0 }
  0x1a   : > { %973 = vmatmul.mubr.msk.f32.vlgmr.msra.gmra.mrb[2].mxu0 %vm175_vm1, %v897_v20  ;;  %1025 = vmatprep.subr.bf16.mxu1 %v1053_v0 }
  0x1b   : > { %980 = vmatmul.mubr.msk.f32.vlgmr.msra.gmra.mrb[2].mxu1 %vm175_vm1, %v902_v22  ;;  %1024 = vmatpush3.bf16.msra.mxu0 %v1023_v21 }
  0x1c   : > { %1027 = vmatpush3.bf16.msra.mxu1 %v1026_v23  ;;  %986 = vmatprep.mubr.msk.f32.mxu0 %vm1054_vm0, %v1055_v1 }
  0x1d   : > { %993 = vmatprep.mubr.msk.f32.mxu1 %vm1054_vm0, %v1055_v1  ;;  %1028 = vmatprep.subr.bf16.mxu0 %v1053_v0 }
  0x1e   : > { %987 = vmatmul.mubr.msk.f32.vlgmr.msra.gmra.mrb[4].mxu0 %vm175_vm1, %v907_v28  ;;  %1031 = vmatprep.subr.bf16.mxu1 %v1053_v0 }
  0x1f   : > { %994 = vmatmul.mubr.msk.f32.vlgmr.msra.gmra.mrb[4].mxu1 %vm175_vm1, %v912_v30  ;;  %1030 = vmatpush3.bf16.msra.mxu0 %v1029_v29 }
  0x20   : > { %1033 = vmatpush3.bf16.msra.mxu1 %v1032_v31  ;;  %1000 = vmatprep.mubr.msk.f32.mxu0 %vm1054_vm0, %v1055_v1 }
  0x21   : > { %1007 = vmatprep.mubr.msk.f32.mxu1 %vm1054_vm0, %v1055_v1 }
  0x22   : > { %1001 = vmatmul.mubr.msk.f32.vlgmr.msra.gmra.mrb[6].mxu0 %vm175_vm1, %v917_v32 }
  0x23   : > { %1008 = vmatmul.mubr.msk.f32.vlgmr.msra.gmra.mrb[6].mxu1 %vm175_vm1, %v922_v33 }
  0xe9   : > { %v245_v34 = vpop.f32.mrb[0].mxu0 }
  0xea   : > { %250 = vst.msk [vmem:[%s170_s22] sm:$0x3] %vm249_vm2, %v245_v34  ;;  %v325_v35 = vpop.f32.mrb[0].mxu1  ;;  %v960_v36 = vpop.f32.mrb[1].mxu0 }
  0xeb   : > { %896 = vst.msk [vmem:[%s170_s22 + $0x2] sm:$0x3] %vm249_vm2, %v325_v35  ;;  %v967_v37 = vpop.f32.mrb[1].mxu1 }
  0xed   : > { %v405_v38 = vpop.f32.mrb[2].mxu0 }
  0xee   : > { %901 = vst.msk [vmem:[%s170_s22 + $0x4] sm:$0x3] %vm249_vm2, %v405_v38  ;;  %v485_v39 = vpop.f32.mrb[2].mxu1  ;;  %v974_v40 = vpop.f32.mrb[3].mxu0 }
  0xef   : > { %906 = vst.msk [vmem:[%s170_s22 + $0x6] sm:$0x3] %vm249_vm2, %v485_v39  ;;  %v981_v41 = vpop.f32.mrb[3].mxu1 }
  0xf1   : > { %v565_v42 = vpop.f32.mrb[4].mxu0 }
  0xf2   : > { %911 = vst.msk [vmem:[%s170_s22 + $0x8] sm:$0x3] %vm249_vm2, %v565_v42  ;;  %v645_v43 = vpop.f32.mrb[4].mxu1  ;;  %v988_v44 = vpop.f32.mrb[5].mxu0 }
  0xf3   : > { %916 = vst.msk [vmem:[%s170_s22 + $0xa] sm:$0x3] %vm249_vm2, %v645_v43  ;;  %v995_v45 = vpop.f32.mrb[5].mxu1 }
  0xf5   : > { %v725_v46 = vpop.f32.mrb[6].mxu0 }
  0xf6   : > { %921 = vst.msk [vmem:[%s170_s22 + $0xc] sm:$0x3] %vm249_vm2, %v725_v46  ;;  %v805_v47 = vpop.f32.mrb[6].mxu1  ;;  %v1002_v48 = vpop.f32.mrb[7].mxu0 }
  0xf7   : > { %926 = vst.msk [vmem:[%s170_s22 + $0xe] sm:$0x3] %vm249_vm2, %v805_v47  ;;  %v1009_v49 = vpop.f32.mrb[7].mxu1 }
  0xf8 PF: > { %s12_s9 = sadd.s32 1, %s1051_s9  }
  0xf9   : > { %p9_p4 = scmp.ge.s32.totalorder %s12_s9, 6  }
  0xfb   :  { %11 = sbr.rel (!%p9_p4) target bundleno = 1 (0x1), region = 82 }

// kernel: reverse.4
= control target key start
LH: loop header
LB: loop body
LE: loop exit
PB: predicated region body
PF: predicated region fallthrough
CT: control target
= control target key end

     0   :  { %v168_v12 = vlaneseq  ;;  %v174_v37 = vld [vmem:[#allocation0 + $0x7] ss:$-1 sm:$0xff]  ;;  %v202_v45 = vld [vmem:[#allocation0 + $0x1f] ss:$-1 sm:$0xff]  ;;  %v230_v53 = vld [vmem:[#allocation0 + $0x37] ss:$-1 sm:$0xff]  ;;  %s1161_s0 = inlined_call_operand.vmem [shape: f32[2,8,25,12], index: 0, kind: input, shape index: {}]   ;;  %s1162_s1 = inlined_call_operand.vmem [shape: f32[2,8,25,12], index: 1, kind: output, shape index: {}]  }
   0x1   :  { %v92_v0 = vld [vmem:[%s1161_s0] sm:$0xff]  ;;  %v94_v1 = vld [vmem:[%s1161_s0 + $0x8] sm:$0xff]  ;;  %v96_v2 = vld [vmem:[%s1161_s0 + $0x10] sm:$0xff]  ;;  %v175_v39 = vrot.slane %v174_v37, 4  ;;  %v203_v47 = vrot.slane %v202_v45, 4  ;;  %v231_v55 = vrot.slane %v230_v53, 4 }
   0x2   :  { %93 = vst [vmem:[#allocation0 + $0x8] sm:$0xff] %v92_v0  ;;  %95 = vst [vmem:[#allocation0 + $0x10] sm:$0xff] %v94_v1  ;;  %v98_v3 = vld [vmem:[%s1161_s0 + $0x18] sm:$0xff]  ;;  %v100_v4 = vld [vmem:[%s1161_s0 + $0x20] sm:$0xff]  ;;  %v974_v25 = vshrl.u32 %v168_v12, 7 }
   0x3   :  { %97 = vst [vmem:[#allocation0 + $0x20] sm:$0xff] %v96_v2  ;;  %v102_v5 = vld [vmem:[%s1161_s0 + $0x28] sm:$0xff]  ;;  %99 = vst [vmem:[#allocation0 + $0x28] sm:$0xff] %v98_v3  ;;  %v104_v6 = vld [vmem:[%s1161_s0 + $0x30] sm:$0xff] }
   0x4   :  { %101 = vst [vmem:[#allocation0 + $0x38] sm:$0xff] %v100_v4  ;;  %103 = vst [vmem:[#allocation0 + $0x40] sm:$0xff] %v102_v5  ;;  %v106_v7 = vld [vmem:[%s1161_s0 + $0x38] sm:$0xff]  ;;  %v108_v8 = vld [vmem:[%s1161_s0 + $0x40] sm:$0xff]  ;;  %vm170_vm0 = vcmp.lt.s32.totalorder %v974_v25, 4 }
   0x5   :  { %105 = vst [vmem:[#allocation0 + $0x50] sm:$0xff] %v104_v6  ;;  %107 = vst [vmem:[#allocation0 + $0x58] sm:$0xff] %v106_v7  ;;  %v110_v9 = vld [vmem:[%s1161_s0 + $0x48] sm:$0xff]  ;;  %v112_v10 = vld [vmem:[%s1161_s0 + $0x50] sm:$0xff] }
   0x6   :  { %109 = vst [vmem:[#allocation0 + $0x68] sm:$0xff] %v108_v8  ;;  %v114_v11 = vld [vmem:[%s1161_s0 + $0x58] sm:$0xff]  ;;  %111 = vst [vmem:[#allocation0 + $0x70] sm:$0xff] %v110_v9  ;;  %v116_v13 = vld [vmem:[%s1161_s0 + $0x60] sm:$0xff] }
   0x7   :  { %113 = vst [vmem:[#allocation0 + $0x80] sm:$0xff] %v112_v10  ;;  %115 = vst [vmem:[#allocation0 + $0x88] sm:$0xff] %v114_v11  ;;  %v118_v14 = vld [vmem:[%s1161_s0 + $0x68] sm:$0xff]  ;;  %v120_v15 = vld [vmem:[%s1161_s0 + $0x70] sm:$0xff] }
   0x8   :  { %117 = vst [vmem:[#allocation0 + $0x98] sm:$0xff] %v116_v13  ;;  %119 = vst [vmem:[#allocation0 + $0xa0] sm:$0xff] %v118_v14  ;;  %v122_v16 = vld [vmem:[%s1161_s0 + $0x78] sm:$0xff]  ;;  %v124_v17 = vld [vmem:[%s1161_s0 + $0x80] sm:$0xff] }
   0x9   :  { %121 = vst [vmem:[#allocation0 + $0xb0] sm:$0xff] %v120_v15  ;;  %v126_v18 = vld [vmem:[%s1161_s0 + $0x88] sm:$0xff]  ;;  %123 = vst [vmem:[#allocation0 + $0xb8] sm:$0xff] %v122_v16  ;;  %v128_v19 = vld [vmem:[%s1161_s0 + $0x90] sm:$0xff] }
   0xa   :  { %125 = vst [vmem:[#allocation0 + $0xc8] sm:$0xff] %v124_v17  ;;  %127 = vst [vmem:[#allocation0 + $0xd0] sm:$0xff] %v126_v18  ;;  %v130_v20 = vld [vmem:[%s1161_s0 + $0x98] sm:$0xff]  ;;  %v132_v21 = vld [vmem:[%s1161_s0 + $0xa0] sm:$0xff] }
   0xb   :  { %129 = vst [vmem:[#allocation0 + $0xe0] sm:$0xff] %v128_v19  ;;  %131 = vst [vmem:[#allocation0 + $0xe8] sm:$0xff] %v130_v20  ;;  %v134_v22 = vld [vmem:[%s1161_s0 + $0xa8] sm:$0xff]  ;;  %v136_v23 = vld [vmem:[%s1161_s0 + $0xb0] sm:$0xff] }
   0xc   :  { %133 = vst [vmem:[#allocation0 + $0xf8] sm:$0xff] %v132_v21  ;;  %v138_v24 = vld [vmem:[%s1161_s0 + $0xb8] sm:$0xff]  ;;  %135 = vst [vmem:[#allocation0 + $0x100] sm:$0xff] %v134_v22  ;;  %v140_v26 = vld [vmem:[%s1161_s0 + $0xc0] sm:$0xff] }
   0xd   :  { %137 = vst [vmem:[#allocation0 + $0x110] sm:$0xff] %v136_v23  ;;  %139 = vst [vmem:[#allocation0 + $0x118] sm:$0xff] %v138_v24  ;;  %v142_v27 = vld [vmem:[%s1161_s0 + $0xc8] sm:$0xff]  ;;  %v144_v28 = vld [vmem:[%s1161_s0 + $0xd0] sm:$0xff] }
   0xe   :  { %141 = vst [vmem:[#allocation0 + $0x128] sm:$0xff] %v140_v26  ;;  %143 = vst [vmem:[#allocation0 + $0x130] sm:$0xff] %v142_v27  ;;  %v146_v29 = vld [vmem:[%s1161_s0 + $0xd8] sm:$0xff]  ;;  %v148_v30 = vld [vmem:[%s1161_s0 + $0xe0] sm:$0xff] }
   0xf   :  { %145 = vst [vmem:[#allocation0 + $0x140] sm:$0xff] %v144_v28  ;;  %v150_v31 = vld [vmem:[%s1161_s0 + $0xe8] sm:$0xff]  ;;  %147 = vst [vmem:[#allocation0 + $0x148] sm:$0xff] %v146_v29  ;;  %v152_v32 = vld [vmem:[%s1161_s0 + $0xf0] sm:$0xff] }
  0x10   :  { %149 = vst [vmem:[#allocation0 + $0x158] sm:$0xff] %v148_v30  ;;  %151 = vst [vmem:[#allocation0 + $0x160] sm:$0xff] %v150_v31  ;;  %v154_v33 = vld [vmem:[%s1161_s0 + $0xf8] sm:$0xff]  ;;  %v161_v34 = vld [vmem:[#allocation0 + $0xf] ss:$-1 sm:$0xff] }
  0x11   :  { %153 = vst [vmem:[#allocation0 + $0x170] sm:$0xff] %v152_v32  ;;  %155 = vst [vmem:[#allocation0 + $0x178] sm:$0xff] %v154_v33  ;;  %v162_v35 = vrot.slane %v161_v34, 4  ;;  %v166_v36 = vld [vmem:[#allocation0 + $0x17] ss:$-1 sm:$0xff] }
  0x12   :  { %v167_v38 = vrot.slane %v166_v36, 4  ;;  %v179_v40 = vld [vmem:[#allocation0 + $0xf] ss:$-1 sm:$0xff]  ;;  %v189_v41 = vld [vmem:[#allocation0 + $0x27] ss:$-1 sm:$0xff]  ;;  %176 = vst [vmem:[#allocation1 + $0x8] sm:$0xff] %v175_v39 }
  0x13   :  { %163 = vst [vmem:[#allocation1] sm:$0xff] %v162_v35  ;;  %v180_v42 = vrot.slane %v179_v40, 4  ;;  %v190_v43 = vrot.slane %v189_v41, 4  ;;  %v194_v44 = vld [vmem:[#allocation0 + $0x2f] ss:$-1 sm:$0xff]  ;;  %204 = vst [vmem:[#allocation1 + $0x18] sm:$0xff] %v203_v47 }
  0x14   :  { %171 = vst.msk [vmem:[#allocation1] sm:$0xff] %vm170_vm0, %v167_v38  ;;  %v195_v46 = vrot.slane %v194_v44, 4  ;;  %v207_v48 = vld [vmem:[#allocation0 + $0x27] ss:$-1 sm:$0xff]  ;;  %v217_v49 = vld [vmem:[#allocation0 + $0x3f] ss:$-1 sm:$0xff] }
  0x15   :  { %184 = vst.msk [vmem:[#allocation1 + $0x8] sm:$0xff] %vm170_vm0, %v180_v42  ;;  %191 = vst [vmem:[#allocation1 + $0x10] sm:$0xff] %v190_v43  ;;  %v208_v50 = vrot.slane %v207_v48, 4  ;;  %v218_v51 = vrot.slane %v217_v49, 4  ;;  %v222_v52 = vld [vmem:[#allocation0 + $0x47] ss:$-1 sm:$0xff] }
  0x16   :  { %199 = vst.msk [vmem:[#allocation1 + $0x10] sm:$0xff] %vm170_vm0, %v195_v46  ;;  %v223_v54 = vrot.slane %v222_v52, 4  ;;  %v235_v56 = vld [vmem:[#allocation0 + $0x3f] ss:$-1 sm:$0xff]  ;;  %v245_v57 = vld [vmem:[#allocation0 + $0x57] ss:$-1 sm:$0xff] }
  0x17   :  { %212 = vst.msk [vmem:[#allocation1 + $0x18] sm:$0xff] %vm170_vm0, %v208_v50  ;;  %219 = vst [vmem:[#allocation1 + $0x20] sm:$0xff] %v218_v51  ;;  %v236_v58 = vrot.slane %v235_v56, 4  ;;  %v246_v59 = vrot.slane %v245_v57, 4  ;;  %v250_v60 = vld [vmem:[#allocation0 + $0x5f] ss:$-1 sm:$0xff] }
  0x18   :  { %v258_v61 = vld [vmem:[#allocation0 + $0x4f] ss:$-1 sm:$0xff]  ;;  %227 = vst.msk [vmem:[#allocation1 + $0x20] sm:$0xff] %vm170_vm0, %v223_v54  ;;  %232 = vst [vmem:[#allocation1 + $0x28] sm:$0xff] %v231_v55  ;;  %v251_v62 = vrot.slane %v250_v60, 4 }
  0x19   :  { %v259_v63 = vrot.slane %v258_v61, 4  ;;  %v263_v0 = vld [vmem:[#allocation0 + $0x57] ss:$-1 sm:$0xff]  ;;  %v273_v1 = vld [vmem:[#allocation0 + $0x6f] ss:$-1 sm:$0xff]  ;;  %240 = vst.msk [vmem:[#allocation1 + $0x28] sm:$0xff] %vm170_vm0, %v236_v58 }
  0x1a   :  { %247 = vst [vmem:[#allocation1 + $0x30] sm:$0xff] %v246_v59  ;;  %v264_v2 = vrot.slane %v263_v0, 4  ;;  %v274_v3 = vrot.slane %v273_v1, 4  ;;  %v278_v4 = vld [vmem:[#allocation0 + $0x77] ss:$-1 sm:$0xff] }
  0x1b   :  { %v286_v5 = vld [vmem:[#allocation0 + $0x67] ss:$-1 sm:$0xff]  ;;  %255 = vst.msk [vmem:[#allocation1 + $0x30] sm:$0xff] %vm170_vm0, %v251_v62  ;;  %260 = vst [vmem:[#allocation1 + $0x38] sm:$0xff] %v259_v63  ;;  %v279_v6 = vrot.slane %v278_v4, 4 }
  0x1c   :  { %v287_v7 = vrot.slane %v286_v5, 4  ;;  %v291_v8 = vld [vmem:[#allocation0 + $0x6f] ss:$-1 sm:$0xff]  ;;  %v301_v9 = vld [vmem:[#allocation0 + $0x87] ss:$-1 sm:$0xff]  ;;  %268 = vst.msk [vmem:[#allocation1 + $0x38] sm:$0xff] %vm170_vm0, %v264_v2 }
  0x1d   :  { %275 = vst [vmem:[#allocation1 + $0x40] sm:$0xff] %v274_v3  ;;  %v292_v10 = vrot.slane %v291_v8, 4  ;;  %v302_v11 = vrot.slane %v301_v9, 4  ;;  %v306_v12 = vld [vmem:[#allocation0 + $0x8f] ss:$-1 sm:$0xff] }
  0x1e   :  { %v314_v13 = vld [vmem:[#allocation0 + $0x7f] ss:$-1 sm:$0xff]  ;;  %283 = vst.msk [vmem:[#allocation1 + $0x40] sm:$0xff] %vm170_vm0, %v279_v6  ;;  %288 = vst [vmem:[#allocation1 + $0x48] sm:$0xff] %v287_v7  ;;  %v307_v14 = vrot.slane %v306_v12, 4 }
  0x1f   :  { %v315_v15 = vrot.slane %v314_v13, 4  ;;  %v319_v16 = vld [vmem:[#allocation0 + $0x87] ss:$-1 sm:$0xff]  ;;  %v329_v17 = vld [vmem:[#allocation0 + $0x9f] ss:$-1 sm:$0xff]  ;;  %296 = vst.msk [vmem:[#allocation1 + $0x48] sm:$0xff] %vm170_vm0, %v292_v10 }
  0x20   :  { %303 = vst [vmem:[#allocation1 + $0x50] sm:$0xff] %v302_v11  ;;  %v320_v18 = vrot.slane %v319_v16, 4  ;;  %v330_v19 = vrot.slane %v329_v17, 4  ;;  %v334_v20 = vld [vmem:[#allocation0 + $0xa7] ss:$-1 sm:$0xff] }
  0x21   :  { %v342_v21 = vld [vmem:[#allocation0 + $0x97] ss:$-1 sm:$0xff]  ;;  %311 = vst.msk [vmem:[#allocation1 + $0x50] sm:$0xff] %vm170_vm0, %v307_v14  ;;  %316 = vst [vmem:[#allocation1 + $0x58] sm:$0xff] %v315_v15  ;;  %v335_v22 = vrot.slane %v334_v20, 4 }
  0x22   :  { %v343_v23 = vrot.slane %v342_v21, 4  ;;  %v347_v24 = vld [vmem:[#allocation0 + $0x9f] ss:$-1 sm:$0xff]  ;;  %v357_v26 = vld [vmem:[#allocation0 + $0xb7] ss:$-1 sm:$0xff]  ;;  %324 = vst.msk [vmem:[#allocation1 + $0x58] sm:$0xff] %vm170_vm0, %v320_v18 }
  0x23   :  { %331 = vst [vmem:[#allocation1 + $0x60] sm:$0xff] %v330_v19  ;;  %v348_v27 = vrot.slane %v347_v24, 4  ;;  %v358_v28 = vrot.slane %v357_v26, 4  ;;  %v362_v29 = vld [vmem:[#allocation0 + $0xbf] ss:$-1 sm:$0xff] }
  0x24   :  { %v370_v30 = vld [vmem:[#allocation0 + $0xaf] ss:$-1 sm:$0xff]  ;;  %339 = vst.msk [vmem:[#allocation1 + $0x60] sm:$0xff] %vm170_vm0, %v335_v22  ;;  %344 = vst [vmem:[#allocation1 + $0x68] sm:$0xff] %v343_v23  ;;  %v363_v31 = vrot.slane %v362_v29, 4 }
  0x25   :  { %v371_v32 = vrot.slane %v370_v30, 4  ;;  %v375_v33 = vld [vmem:[#allocation0 + $0xb7] ss:$-1 sm:$0xff]  ;;  %v385_v34 = vld [vmem:[#allocation0 + $0xcf] ss:$-1 sm:$0xff]  ;;  %352 = vst.msk [vmem:[#allocation1 + $0x68] sm:$0xff] %vm170_vm0, %v348_v27 }
  0x26   :  { %359 = vst [vmem:[#allocation1 + $0x70] sm:$0xff] %v358_v28  ;;  %v376_v35 = vrot.slane %v375_v33, 4  ;;  %v386_v36 = vrot.slane %v385_v34, 4  ;;  %v390_v37 = vld [vmem:[#allocation0 + $0xd7] ss:$-1 sm:$0xff]  ;;  %v710_v25 = vld [vmem:[#allocation1 + $0x40] sm:$0xff] }
  0x27   :  { %v398_v38 = vld [vmem:[#allocation0 + $0xc7] ss:$-1 sm:$0xff]  ;;  %367 = vst.msk [vmem:[#allocation1 + $0x70] sm:$0xff] %vm170_vm0, %v363_v31  ;;  %372 = vst [vmem:[#allocation1 + $0x78] sm:$0xff] %v371_v32  ;;  %v391_v39 = vrot.slane %v390_v37, 4 }
  0x28   :  { %v399_v40 = vrot.slane %v398_v38, 4  ;;  %v403_v41 = vld [vmem:[#allocation0 + $0xcf] ss:$-1 sm:$0xff]  ;;  %v413_v42 = vld [vmem:[#allocation0 + $0xe7] ss:$-1 sm:$0xff]  ;;  %380 = vst.msk [vmem:[#allocation1 + $0x78] sm:$0xff] %vm170_vm0, %v376_v35 }
  0x29   :  { %387 = vst [vmem:[#allocation1 + $0x80] sm:$0xff] %v386_v36  ;;  %v404_v43 = vrot.slane %v403_v41, 4  ;;  %v414_v44 = vrot.slane %v413_v42, 4  ;;  %v418_v45 = vld [vmem:[#allocation0 + $0xef] ss:$-1 sm:$0xff]  ;;  %v694_v35 = vld [vmem:[#allocation1] sm:$0xff] }
  0x2a   :  { %v426_v46 = vld [vmem:[#allocation0 + $0xdf] ss:$-1 sm:$0xff]  ;;  %395 = vst.msk [vmem:[#allocation1 + $0x80] sm:$0xff] %vm170_vm0, %v391_v39  ;;  %400 = vst [vmem:[#allocation1 + $0x88] sm:$0xff] %v399_v40  ;;  %v419_v47 = vrot.slane %v418_v45, 4  ;;  %v696_v36 = vld [vmem:[#allocation1 + $0x8] sm:$0xff] }
  0x2b   :  { %v427_v48 = vrot.slane %v426_v46, 4  ;;  %v431_v49 = vld [vmem:[#allocation0 + $0xe7] ss:$-1 sm:$0xff]  ;;  %v441_v50 = vld [vmem:[#allocation0 + $0xff] ss:$-1 sm:$0xff]  ;;  %408 = vst.msk [vmem:[#allocation1 + $0x88] sm:$0xff] %vm170_vm0, %v404_v43  ;;  %695 = vst [vmem:[%s1162_s1] sm:$0xff] %v694_v35 }
  0x2c   :  { %415 = vst [vmem:[#allocation1 + $0x90] sm:$0xff] %v414_v44  ;;  %v432_v51 = vrot.slane %v431_v49, 4  ;;  %v442_v52 = vrot.slane %v441_v50, 4  ;;  %v446_v53 = vld [vmem:[#allocation0 + $0x107] ss:$-1 sm:$0xff]  ;;  %697 = vst [vmem:[%s1162_s1 + $0x8] sm:$0xff] %v696_v36 }
  0x2d   :  { %v454_v54 = vld [vmem:[#allocation0 + $0xf7] ss:$-1 sm:$0xff]  ;;  %423 = vst.msk [vmem:[#allocation1 + $0x90] sm:$0xff] %vm170_vm0, %v419_v47  ;;  %428 = vst [vmem:[#allocation1 + $0x98] sm:$0xff] %v427_v48  ;;  %v447_v55 = vrot.slane %v446_v53, 4  ;;  %v700_v39 = vld [vmem:[#allocation1 + $0x18] sm:$0xff] }
  0x2e   :  { %v455_v56 = vrot.slane %v454_v54, 4  ;;  %v459_v57 = vld [vmem:[#allocation0 + $0xff] ss:$-1 sm:$0xff]  ;;  %v469_v58 = vld [vmem:[#allocation0 + $0x117] ss:$-1 sm:$0xff]  ;;  %436 = vst.msk [vmem:[#allocation1 + $0x98] sm:$0xff] %vm170_vm0, %v432_v51 }
  0x2f   :  { %443 = vst [vmem:[#allocation1 + $0xa0] sm:$0xff] %v442_v52  ;;  %v460_v59 = vrot.slane %v459_v57, 4  ;;  %v470_v60 = vrot.slane %v469_v58, 4  ;;  %v474_v61 = vld [vmem:[#allocation0 + $0x11f] ss:$-1 sm:$0xff]  ;;  %v698_v38 = vld [vmem:[#allocation1 + $0x10] sm:$0xff] }
  0x30   :  { %v482_v62 = vld [vmem:[#allocation0 + $0x10f] ss:$-1 sm:$0xff]  ;;  %451 = vst.msk [vmem:[#allocation1 + $0xa0] sm:$0xff] %vm170_vm0, %v447_v55  ;;  %456 = vst [vmem:[#allocation1 + $0xa8] sm:$0xff] %v455_v56  ;;  %v475_v63 = vrot.slane %v474_v61, 4  ;;  %v702_v40 = vld [vmem:[#allocation1 + $0x20] sm:$0xff] }
  0x31   :  { %v483_v0 = vrot.slane %v482_v62, 4  ;;  %v487_v1 = vld [vmem:[#allocation0 + $0x117] ss:$-1 sm:$0xff]  ;;  %v497_v2 = vld [vmem:[#allocation0 + $0x12f] ss:$-1 sm:$0xff]  ;;  %464 = vst.msk [vmem:[#allocation1 + $0xa8] sm:$0xff] %vm170_vm0, %v460_v59 }
  0x32   :  { %471 = vst [vmem:[#allocation1 + $0xb0] sm:$0xff] %v470_v60  ;;  %v488_v3 = vrot.slane %v487_v1, 4  ;;  %v498_v4 = vrot.slane %v497_v2, 4  ;;  %v502_v5 = vld [vmem:[#allocation0 + $0x137] ss:$-1 sm:$0xff]  ;;  %699 = vst [vmem:[%s1162_s1 + $0x10] sm:$0xff] %v698_v38 }
  0x33   :  { %v510_v6 = vld [vmem:[#allocation0 + $0x127] ss:$-1 sm:$0xff]  ;;  %479 = vst.msk [vmem:[#allocation1 + $0xb0] sm:$0xff] %vm170_vm0, %v475_v63  ;;  %484 = vst [vmem:[#allocation1 + $0xb8] sm:$0xff] %v483_v0  ;;  %v503_v7 = vrot.slane %v502_v5, 4  ;;  %v704_v41 = vld [vmem:[#allocation1 + $0x28] sm:$0xff] }
  0x34   :  { %v511_v8 = vrot.slane %v510_v6, 4  ;;  %v515_v9 = vld [vmem:[#allocation0 + $0x12f] ss:$-1 sm:$0xff]  ;;  %v525_v10 = vld [vmem:[#allocation0 + $0x147] ss:$-1 sm:$0xff]  ;;  %492 = vst.msk [vmem:[#allocation1 + $0xb8] sm:$0xff] %vm170_vm0, %v488_v3 }
  0x35   :  { %499 = vst [vmem:[#allocation1 + $0xc0] sm:$0xff] %v498_v4  ;;  %v516_v11 = vrot.slane %v515_v9, 4  ;;  %v526_v12 = vrot.slane %v525_v10, 4  ;;  %v530_v13 = vld [vmem:[#allocation0 + $0x14f] ss:$-1 sm:$0xff]  ;;  %701 = vst [vmem:[%s1162_s1 + $0x18] sm:$0xff] %v700_v39 }
  0x36   :  { %v538_v14 = vld [vmem:[#allocation0 + $0x13f] ss:$-1 sm:$0xff]  ;;  %507 = vst.msk [vmem:[#allocation1 + $0xc0] sm:$0xff] %vm170_vm0, %v503_v7  ;;  %512 = vst [vmem:[#allocation1 + $0xc8] sm:$0xff] %v511_v8  ;;  %v531_v15 = vrot.slane %v530_v13, 4  ;;  %v706_v42 = vld [vmem:[#allocation1 + $0x30] sm:$0xff] }
  0x37   :  { %v539_v16 = vrot.slane %v538_v14, 4  ;;  %v543_v17 = vld [vmem:[#allocation0 + $0x147] ss:$-1 sm:$0xff]  ;;  %v553_v18 = vld [vmem:[#allocation0 + $0x15f] ss:$-1 sm:$0xff]  ;;  %520 = vst.msk [vmem:[#allocation1 + $0xc8] sm:$0xff] %vm170_vm0, %v516_v11 }
  0x38   :  { %527 = vst [vmem:[#allocation1 + $0xd0] sm:$0xff] %v526_v12  ;;  %v544_v19 = vrot.slane %v543_v17, 4  ;;  %v554_v20 = vrot.slane %v553_v18, 4  ;;  %v558_v21 = vld [vmem:[#allocation0 + $0x167] ss:$-1 sm:$0xff]  ;;  %703 = vst [vmem:[%s1162_s1 + $0x20] sm:$0xff] %v702_v40 }
  0x39   :  { %v566_v22 = vld [vmem:[#allocation0 + $0x157] ss:$-1 sm:$0xff]  ;;  %535 = vst.msk [vmem:[#allocation1 + $0xd0] sm:$0xff] %vm170_vm0, %v531_v15  ;;  %540 = vst [vmem:[#allocation1 + $0xd8] sm:$0xff] %v539_v16  ;;  %v559_v23 = vrot.slane %v558_v21, 4  ;;  %v708_v43 = vld [vmem:[#allocation1 + $0x38] sm:$0xff] }
  0x3a   :  { %v567_v24 = vrot.slane %v566_v22, 4  ;;  %v571_v26 = vld [vmem:[#allocation0 + $0x15f] ss:$-1 sm:$0xff]  ;;  %v581_v27 = vld [vmem:[#allocation0 + $0x177] ss:$-1 sm:$0xff]  ;;  %548 = vst.msk [vmem:[#allocation1 + $0xd8] sm:$0xff] %vm170_vm0, %v544_v19 }
  0x3b   :  { %555 = vst [vmem:[#allocation1 + $0xe0] sm:$0xff] %v554_v20  ;;  %v572_v28 = vrot.slane %v571_v26, 4  ;;  %v582_v29 = vrot.slane %v581_v27, 4  ;;  %v586_v30 = vld [vmem:[#allocation0 + $0x17f] ss:$-1 sm:$0xff]  ;;  %705 = vst [vmem:[%s1162_s1 + $0x28] sm:$0xff] %v704_v41 }
  0x3c   :  { %v594_v31 = vld [vmem:[#allocation0 + $0x16f] ss:$-1 sm:$0xff]  ;;  %563 = vst.msk [vmem:[#allocation1 + $0xe0] sm:$0xff] %vm170_vm0, %v559_v23  ;;  %568 = vst [vmem:[#allocation1 + $0xe8] sm:$0xff] %v567_v24  ;;  %v587_v32 = vrot.slane %v586_v30, 4  ;;  %v714_v45 = vld [vmem:[#allocation1 + $0x50] sm:$0xff] }
  0x3d   :  { %v595_v33 = vrot.slane %v594_v31, 4  ;;  %v599_v34 = vld [vmem:[#allocation0 + $0x177] ss:$-1 sm:$0xff]  ;;  %576 = vst.msk [vmem:[#allocation1 + $0xe8] sm:$0xff] %vm170_vm0, %v572_v28  ;;  %583 = vst [vmem:[#allocation1 + $0xf0] sm:$0xff] %v582_v29  ;;  %v712_v44 = vld [vmem:[#allocation1 + $0x48] sm:$0xff] }
  0x3e   :  { %v600_v37 = vrot.slane %v599_v34, 4  ;;  %591 = vst.msk [vmem:[#allocation1 + $0xf0] sm:$0xff] %vm170_vm0, %v587_v32  ;;  %707 = vst [vmem:[%s1162_s1 + $0x30] sm:$0xff] %v706_v42  ;;  %v716_v46 = vld [vmem:[#allocation1 + $0x58] sm:$0xff]  ;;  %v718_v47 = vld [vmem:[#allocation1 + $0x60] sm:$0xff] }
  0x3f   :  { %596 = vst [vmem:[#allocation1 + $0xf8] sm:$0xff] %v595_v33  ;;  %709 = vst [vmem:[%s1162_s1 + $0x38] sm:$0xff] %v708_v43  ;;  %v720_v48 = vld [vmem:[#allocation1 + $0x68] sm:$0xff]  ;;  %v722_v49 = vld [vmem:[#allocation1 + $0x70] sm:$0xff] }
  0x40   :  { %604 = vst.msk [vmem:[#allocation1 + $0xf8] sm:$0xff] %vm170_vm0, %v600_v37  ;;  %711 = vst [vmem:[%s1162_s1 + $0x40] sm:$0xff] %v710_v25  ;;  %v724_v50 = vld [vmem:[#allocation1 + $0x78] sm:$0xff]  ;;  %v726_v51 = vld [vmem:[#allocation1 + $0x80] sm:$0xff] }
  0x41   :  { %713 = vst [vmem:[%s1162_s1 + $0x48] sm:$0xff] %v712_v44  ;;  %715 = vst [vmem:[%s1162_s1 + $0x50] sm:$0xff] %v714_v45  ;;  %v728_v52 = vld [vmem:[#allocation1 + $0x88] sm:$0xff]  ;;  %v730_v53 = vld [vmem:[#allocation1 + $0x90] sm:$0xff] }
  0x42   :  { %717 = vst [vmem:[%s1162_s1 + $0x58] sm:$0xff] %v716_v46  ;;  %719 = vst [vmem:[%s1162_s1 + $0x60] sm:$0xff] %v718_v47  ;;  %v732_v54 = vld [vmem:[#allocation1 + $0x98] sm:$0xff]  ;;  %v734_v55 = vld [vmem:[#allocation1 + $0xa0] sm:$0xff] }
  0x43   :  { %721 = vst [vmem:[%s1162_s1 + $0x68] sm:$0xff] %v720_v48  ;;  %723 = vst [vmem:[%s1162_s1 + $0x70] sm:$0xff] %v722_v49  ;;  %v736_v56 = vld [vmem:[#allocation1 + $0xa8] sm:$0xff]  ;;  %v738_v57 = vld [vmem:[#allocation1 + $0xb0] sm:$0xff] }
  0x44   :  { %725 = vst [vmem:[%s1162_s1 + $0x78] sm:$0xff] %v724_v50  ;;  %727 = vst [vmem:[%s1162_s1 + $0x80] sm:$0xff] %v726_v51  ;;  %v740_v58 = vld [vmem:[#allocation1 + $0xb8] sm:$0xff]  ;;  %v742_v59 = vld [vmem:[#allocation1 + $0xc0] sm:$0xff] }
  0x45   :  { %729 = vst [vmem:[%s1162_s1 + $0x88] sm:$0xff] %v728_v52  ;;  %731 = vst [vmem:[%s1162_s1 + $0x90] sm:$0xff] %v730_v53  ;;  %v744_v60 = vld [vmem:[#allocation1 + $0xc8] sm:$0xff]  ;;  %v746_v61 = vld [vmem:[#allocation1 + $0xd0] sm:$0xff] }
  0x46   :  { %733 = vst [vmem:[%s1162_s1 + $0x98] sm:$0xff] %v732_v54  ;;  %735 = vst [vmem:[%s1162_s1 + $0xa0] sm:$0xff] %v734_v55  ;;  %v748_v62 = vld [vmem:[#allocation1 + $0xd8] sm:$0xff]  ;;  %v750_v63 = vld [vmem:[#allocation1 + $0xe0] sm:$0xff] }
  0x47   :  { %737 = vst [vmem:[%s1162_s1 + $0xa8] sm:$0xff] %v736_v56  ;;  %739 = vst [vmem:[%s1162_s1 + $0xb0] sm:$0xff] %v738_v57  ;;  %v752_v0 = vld [vmem:[#allocation1 + $0xe8] sm:$0xff]  ;;  %v754_v1 = vld [vmem:[#allocation1 + $0xf0] sm:$0xff] }
  0x48   :  { %741 = vst [vmem:[%s1162_s1 + $0xb8] sm:$0xff] %v740_v58  ;;  %743 = vst [vmem:[%s1162_s1 + $0xc0] sm:$0xff] %v742_v59  ;;  %v756_v2 = vld [vmem:[#allocation1 + $0xf8] sm:$0xff] }
  0x49   :  { %745 = vst [vmem:[%s1162_s1 + $0xc8] sm:$0xff] %v744_v60  ;;  %747 = vst [vmem:[%s1162_s1 + $0xd0] sm:$0xff] %v746_v61 }
  0x4a   :  { %749 = vst [vmem:[%s1162_s1 + $0xd8] sm:$0xff] %v748_v62  ;;  %751 = vst [vmem:[%s1162_s1 + $0xe0] sm:$0xff] %v750_v63 }
  0x4b   :  { %753 = vst [vmem:[%s1162_s1 + $0xe8] sm:$0xff] %v752_v0  ;;  %755 = vst [vmem:[%s1162_s1 + $0xf0] sm:$0xff] %v754_v1 }
  0x4c   :  { %757 = vst [vmem:[%s1162_s1 + $0xf8] sm:$0xff] %v756_v2 }

// kernel: _lambda_.10
= control target key start
LH: loop header
LB: loop body
LE: loop exit
PB: predicated region body
PF: predicated region fallthrough
CT: control target
= control target key end

     0   :  { %s1386_s27 = smov 0   ;;  %s1388_s28 = smov 0   ;;  %s1469_s0 = inlined_call_operand.vmem [shape: f32[2,8,625], index: 0, kind: input, shape index: {}]   ;;  %s1470_s1 = inlined_call_operand.vmem [shape: f32[2,8,625], index: 1, kind: input, shape index: {}]   ;;  %s1471_s2 = inlined_call_operand.vmem [shape: f32[8,8], index: 2, kind: input, shape index: {}]   ;;  %s1472_s3 = inlined_call_operand.vmem [shape: f32[8,1], index: 3, kind: input, shape index: {}]   ;;  %s1473_s4 = inlined_call_operand.vmem [shape: f32[8,8], index: 4, kind: input, shape index: {}]   ;;  %s1474_s5 = inlined_call_operand.vmem [shape: f32[8,1], index: 5, kind: input, shape index: {}]   ;;  %s1475_s6 = inlined_call_operand.vmem [shape: f32[8,8], index: 6, kind: input, shape index: {}]   ;;  %s1476_s7 = inlined_call_operand.vmem [shape: f32[8,1], index: 7, kind: input, shape index: {}]   ;;  %s1477_s8 = inlined_call_operand.vmem [shape: f32[2,8,625], index: 8, kind: output, shape index: {}]  }
   0x1   :  { %s1390_s29 = smov 0  }
   0x2 LB: > { %s30_s30 = sadd.s32 1, %s1332_s28  ;;  %p1228_p0 = scmp.ge.s32.totalorder %s1336_s29, 1  ;;  %s1336_s29 = sphi %s1390_s29, %s18_s29   ;;  %s1332_s28 = sphi %s1388_s28, %s1479_s28   ;;  %s1328_s27 = sphi %s1386_s27, %s1478_s27  }
   0x3   : > { %p32_p1 = scmp.ge.s32.totalorder %s30_s30, 2  ;;  %p300_p2 = scmp.lt.s32.totalorder %s1336_s29, 3 }
   0x5   : > { %s1481_s30 = smov (%p32_p1, %s30_s30), 0  ;;  %p301_p3 = pnand %p1228_p0, %p300_p2 }
   0x6   : > { %p352_p4 = scmp.lt.s32.totalorder (!%p301_p3), %s1328_s27, 1  ;;  %v1338_v0 = vmov (!%p301_p3), 0.0   ;;  %v387_v1 = vld [vmem:[%s1472_s3] sm:$0xff] (!%p301_p3)  ;;  %v1339_v2 = vmov (!%p301_p3), 0   ;;  %vm393_vm0 = vcmask (!%p301_p3), 64512   ;;  %vm1340_vm1 = vmmov (!%p301_p3), 0  }
   0x7   : > { %304 = sbr.rel (%p301_p3) target bundleno = 711 (0x2c7), region = 52  ;;  %461 = vmatprep.mubr.f32.mxu0 (!%p301_p3), %v1338_v0  ;;  %532 = vmatprep.mubr.f32.mxu1 (!%p301_p3), %v1338_v0  ;;  %v610_v3 = vld [vmem:[%s1474_s5] sm:$0xff] (!%p301_p3)  ;;  %vm1117_vm2 = vcmask (!%p301_p3), 924672  }
   0x8   : > { %1292 = vset.pattern.permute.xlu0 (!%p301_p3), %v1339_v2  ;;  %1293 = vset.pattern.permute.xlu1 (!%p301_p3), %v1339_v2  ;;  %v386_v4 = vld [vmem:[%s1471_s2] sm:$0xff] (!%p301_p3) }
   0x9   : > { %390 = vperm.xlu0 (!%p301_p3), %1292, %v387_v1   ;;  %v609_v19 = vld [vmem:[%s1473_s4] sm:$0xff] (!%p301_p3) }
   0xa   : > { %v857_v23 = vld [vmem:[%s1476_s7] sm:$0xff] (!%p301_p3) }
   0xb   : > { %860 = vperm.xlu1 (!%p301_p3), %1293, %v857_v23   ;;  %v856_v59 = vld [vmem:[%s1475_s6] sm:$0xff] (!%p301_p3) }
   0xd   : > { %613 = vperm.xlu0 (!%p301_p3), %1292, %v610_v3  }
   0xe   : > { %s1483_s27 = smov (!%p352_p4, %s1328_s27), 1 }
   0xf   : > { %s1409_s11 = smul.u32 40, %s1483_s27 }
  0x11   : > { %s359_s16 = scalar_lea.vmem %s1469_s0, %s1409_s11  ;;  %s369_s27 = scalar_lea.vmem %s1470_s1, %s1409_s11 }
  0x12   : > { %v382_v5 = vld [vmem:[%s359_s16 + $0x8] sm:$0xff]  ;;  %v384_v6 = vld [vmem:[%s359_s16 + $0x18] sm:$0xff]  ;;  %v381_v7 = vld [vmem:[%s359_s16] sm:$0xff]  ;;  %s379_s12 = scalar_lea.vmem %s1477_s8, %s1409_s11 }
  0x13   : > { %397 = vmatprep.subr.mxu0 %v382_v5  ;;  %468 = vmatprep.subr.mxu1 %v384_v6  ;;  %v383_v8 = vld [vmem:[%s359_s16 + $0x10] sm:$0xff]  ;;  %v385_v9 = vld [vmem:[%s359_s16 + $0x20] sm:$0xff]  ;;  %v1079_v6 = vld [vmem:[%s369_s27 + $0x8] sm:$0xff] }
  0x14   : > { %398 = vmatpush1.msra.mxu0 %v381_v7  ;;  %469 = vmatpush1.msra.mxu1 %v383_v8  ;;  %v1078_v1 = vld [vmem:[%s369_s27] sm:$0xff] }
  0x15   : > { %1232 = vmatmul.mubr.msk.f32.vlgmr.msra.gmra.mrb[0].mxu0 %vm393_vm0, %v386_v4  ;;  %1233 = vmatmul.mubr.msk.f32.vlgmr.msra.gmra.mrb[0].mxu1 %vm393_vm0, %v386_v4 }
  0x16   : > { %1249 = vmatprep.subr.mxu0 %v1338_v0  ;;  %1251 = vmatprep.mubr.msk.f32.mxu0 %vm1340_vm1, %v1338_v0 }
  0x17   : > { %1250 = vmatpush3.msra.mxu0 %v385_v9  ;;  %683 = vmatprep.mubr.f32.mxu1 %v1338_v0 }
  0x19   : > { %1252 = vmatmul.mubr.msk.f32.vlgmr.msra.gmra.mrb[2].mxu0 %vm393_vm0, %v386_v4  ;;  %v1080_v4 = vld [vmem:[%s369_s27 + $0x10] sm:$0xff] }
  0x1a   : > { %754 = vmatprep.mubr.f32.mxu0 %v1338_v0 }
  0x88   : > { %v391_v10 = vpop.permute.xlu0 %390 }
  0x8a   : > { %v861_v62 = vpop.permute.xlu1 %860 }
  0x8c   : > { %v614_v24 = vpop.permute.xlu0 %613 }
  0xe8   : > { %v463_v11 = vpop.f32.mrb[0].mxu0  ;;  %v534_v12 = vpop.f32.mrb[0].mxu1 }
  0xe9   : > { %v535_v13 = vadd.f32 %v534_v12, %v391_v10  ;;  %v465_v14 = vpop.f32.mrb[1].mxu0  ;;  %v536_v15 = vpop.f32.mrb[1].mxu1  ;;  %v464_v18 = vadd.f32 %v463_v11, %v391_v10 }
  0xea   : > { %v466_v16 = vadd.f32 %v465_v14, %v391_v10  ;;  %v537_v17 = vadd.f32 %v536_v15, %v391_v10  ;;  %v1082_v15 = vld [vmem:[%s369_s27 + $0x20] sm:$0xff] }
  0xec   : > { %v605_v20 = vpop.f32.mrb[2].mxu0  ;;  %619 = vmatprep.subr.mxu1 %v466_v16  ;;  %690 = vmatprep.subr.mxu0 %v537_v17 }
  0xed   : > { %v606_v21 = vadd.f32 %v605_v20, %v391_v10  ;;  %620 = vmatpush1.msra.mxu1 %v464_v18  ;;  %691 = vmatpush1.msra.mxu0 %v535_v13  ;;  %v1253_v22 = vpop.f32.mrb[3].mxu0  ;;  %v1081_v10 = vld [vmem:[%s369_s27 + $0x18] sm:$0xff] }
  0xee   : > { %1235 = vmatmul.mubr.msk.f32.vlgmr.msra.gmra.mrb[2].mxu1 %vm393_vm0, %v609_v19  ;;  %1236 = vmatmul.mubr.msk.f32.vlgmr.msra.gmra.mrb[4].mxu0 %vm393_vm0, %v609_v19 }
  0xef   : > { %1254 = vmatprep.subr.mxu1 %v1338_v0  ;;  %1256 = vmatprep.mubr.msk.f32.mxu1 %vm1340_vm1, %v1338_v0 }
  0xf0   : > { %1255 = vmatpush3.msra.mxu1 %v606_v21  ;;  %930 = vmatprep.mubr.f32.mxu0 %v1338_v0 }
  0xf2   : > { %1257 = vmatmul.mubr.msk.f32.vlgmr.msra.gmra.mrb[4].mxu1 %vm393_vm0, %v609_v19 }
  0xf3   : > { %1001 = vmatprep.mubr.f32.mxu1 %v1338_v0 }
 0x1c1   : > { %v685_v25 = vpop.f32.mrb[2].mxu1  ;;  %v756_v26 = vpop.f32.mrb[4].mxu0 }
 0x1c2   : > { %v686_v27 = vadd.f32 %v685_v25, %v614_v24  ;;  %v757_v28 = vadd.f32 %v756_v26, %v614_v24  ;;  %v687_v29 = vpop.f32.mrb[3].mxu1  ;;  %v758_v30 = vpop.f32.mrb[5].mxu0 }
 0x1c3   : > { %v688_v31 = vadd.f32 %v687_v29, %v614_v24  ;;  %v759_v32 = vadd.f32 %v758_v30, %v614_v24 }
 0x1c4   : > { %v836_v33 = vmul.f32 0.70710677, %v686_v27  ;;  %v838_v34 = vmul.f32 0.70710677, %v757_v28  ;;  %v831_v49 = vmul.f32 0.5, %v686_v27  ;;  %v833_v53 = vmul.f32 0.5, %v757_v28 }
 0x1c5   : > { %v837_v35 = vmul.f32 0.70710677, %v688_v31  ;;  %v839_v36 = vmul.f32 0.70710677, %v759_v32  ;;  %v827_v37 = vpop.f32.mrb[4].mxu1  ;;  %v832_v47 = vmul.f32 0.5, %v688_v31 }
 0x1c6   : > { %1294 = verf.f32 %v836_v33  ;;  %v828_v38 = vadd.f32 %v827_v37, %v614_v24  ;;  %v1258_v39 = vpop.f32.mrb[5].mxu1  ;;  %v834_v50 = vmul.f32 0.5, %v759_v32 }
 0x1c7   : > { %1296 = verf.f32 %v838_v34 }
 0x1c8   : > { %1298 = verf.f32 %v837_v35  ;;  %v840_v40 = vmul.f32 0.70710677, %v828_v38  ;;  %v835_v56 = vmul.f32 0.5, %v828_v38 }
 0x1c9   : > { %1300 = verf.f32 %v839_v36 }
 0x1ca   : > { %1302 = verf.f32 %v840_v40 }
 0x1d0   : > { %v1295_v41 = vpop.eup %1294 }
 0x1d1   : > { %v1297_v42 = vpop.eup %1296  ;;  %v846_v44 = vadd.f32 1.0, %v1295_v41 }
 0x1d2   : > { %v1299_v43 = vpop.eup %1298  ;;  %v848_v46 = vadd.f32 1.0, %v1297_v42 }
 0x1d3   : > { %v1301_v45 = vpop.eup %1300  ;;  %v847_v48 = vadd.f32 1.0, %v1299_v43  ;;  %v851_v55 = vmul.f32 %v846_v44, %v831_v49 }
 0x1d4   : > { %v849_v51 = vadd.f32 1.0, %v1301_v45  ;;  %v1303_v52 = vpop.eup %1302  ;;  %v853_v60 = vmul.f32 %v848_v46, %v833_v53 }
 0x1d5   : > { %v852_v54 = vmul.f32 %v847_v48, %v832_v47  ;;  %v850_v57 = vadd.f32 1.0, %v1303_v52 }
 0x1d6   : > { %v854_v58 = vmul.f32 %v849_v51, %v834_v50 }
 0x1d7   : > { %866 = vmatprep.subr.mxu0 %v852_v54  ;;  %v855_v61 = vmul.f32 %v850_v57, %v835_v56 }
 0x1d8   : > { %937 = vmatprep.subr.mxu1 %v854_v58  ;;  %867 = vmatpush1.msra.mxu0 %v851_v55 }
 0x1d9   : > { %938 = vmatpush1.msra.mxu1 %v853_v60  ;;  %1238 = vmatmul.mubr.msk.f32.vlgmr.msra.gmra.mrb[6].mxu0 %vm393_vm0, %v856_v59 }
 0x1da   : > { %1239 = vmatmul.mubr.msk.f32.vlgmr.msra.gmra.mrb[6].mxu1 %vm393_vm0, %v856_v59  ;;  %1259 = vmatprep.subr.mxu0 %v1338_v0 }
 0x1db   : > { %1260 = vmatpush3.msra.mxu0 %v855_v61  ;;  %1261 = vmatprep.mubr.msk.f32.mxu0 %vm1340_vm1, %v1338_v0 }
 0x1dd   : > { %1262 = vmatmul.mubr.msk.f32.vlgmr.msra.gmra.mrb[8].mxu0 %vm393_vm0, %v856_v59 }
 0x2ac   : > { %v932_v63 = vpop.f32.mrb[6].mxu0 }
 0x2ad   : > { %v933_v2 = vadd.f32 %v932_v63, %v861_v62  ;;  %v1003_v3 = vpop.f32.mrb[6].mxu1  ;;  %v934_v5 = vpop.f32.mrb[7].mxu0 }
 0x2ae   : > { %v1004_v7 = vadd.f32 %v1003_v3, %v861_v62  ;;  %v935_v8 = vadd.f32 %v934_v5, %v861_v62  ;;  %v1005_v9 = vpop.f32.mrb[7].mxu1 }
 0x2af   : > { %v1083_v11 = vadd.f32 %v1078_v1, %v933_v2  ;;  %v1006_v0 = vadd.f32 %v1005_v9, %v861_v62 }
 0x2b0   : > { %v1085_v12 = vadd.f32 %v1080_v4, %v1004_v7  ;;  %v1084_v13 = vadd.f32 %v1079_v6, %v935_v8  ;;  %v1074_v14 = vpop.f32.mrb[8].mxu0 }
 0x2b1   : > { %v1093_v16 = vmul.f32 0.70710677, %v1083_v11  ;;  %v1086_v17 = vadd.f32 %v1081_v10, %v1006_v0  ;;  %v1075_v18 = vadd.f32 %v1074_v14, %v861_v62  ;;  %v1263_v19 = vpop.f32.mrb[9].mxu0  ;;  %v1088_v27 = vmul.f32 0.5, %v1083_v11 }
 0x2b2   : > { %v1095_v20 = vmul.f32 0.70710677, %v1085_v12  ;;  %v1094_v21 = vmul.f32 0.70710677, %v1084_v13  ;;  %v1090_v30 = vmul.f32 0.5, %v1085_v12  ;;  %v1089_v34 = vmul.f32 0.5, %v1084_v13 }
 0x2b3   : > { %1304 = verf.f32 %v1093_v16  ;;  %v1096_v22 = vmul.f32 0.70710677, %v1086_v17  ;;  %v1087_v23 = vadd.f32 %v1082_v15, %v1075_v18  ;;  %v1091_v38 = vmul.f32 0.5, %v1086_v17 }
 0x2b4   : > { %1306 = verf.f32 %v1095_v20 }
 0x2b5   : > { %1308 = verf.f32 %v1094_v21  ;;  %v1097_v24 = vmul.f32 0.70710677, %v1087_v23  ;;  %v1092_v41 = vmul.f32 0.5, %v1087_v23 }
 0x2b6   : > { %1310 = verf.f32 %v1096_v22 }
 0x2b7   : > { %1312 = verf.f32 %v1097_v24 }
 0x2bd   : > { %v1305_v25 = vpop.eup %1304 }
 0x2be   : > { %v1307_v26 = vpop.eup %1306  ;;  %v1103_v28 = vadd.f32 1.0, %v1305_v25 }
 0x2bf   : > { %v1309_v29 = vpop.eup %1308  ;;  %v1105_v31 = vadd.f32 1.0, %v1307_v26 }
 0x2c0   : > { %v1311_v32 = vpop.eup %1310  ;;  %v1108_v33 = vmul.f32 %v1103_v28, %v1088_v27  ;;  %v1104_v35 = vadd.f32 1.0, %v1309_v29 }
 0x2c1   : > { %v1313_v36 = vpop.eup %1312  ;;  %v1110_v37 = vmul.f32 %v1105_v31, %v1090_v30  ;;  %v1106_v39 = vadd.f32 1.0, %v1311_v32 }
 0x2c2   : > { %1113 = vst [vmem:[%s379_s12] sm:$0xff] %v1108_v33  ;;  %v1109_v40 = vmul.f32 %v1104_v35, %v1089_v34  ;;  %v1107_v42 = vadd.f32 1.0, %v1313_v36 }
 0x2c3   : > { %1115 = vst [vmem:[%s379_s12 + $0x10] sm:$0xff] %v1110_v37  ;;  %v1111_v43 = vmul.f32 %v1106_v39, %v1091_v38 }
 0x2c4   : > { %1114 = vst [vmem:[%s379_s12 + $0x8] sm:$0xff] %v1109_v40  ;;  %v1112_v44 = vmul.f32 %v1107_v42, %v1092_v41 }
 0x2c5   : > { %1116 = vst [vmem:[%s379_s12 + $0x18] sm:$0xff] %v1111_v43 }
 0x2c6   : > { %1118 = vst.msk [vmem:[%s379_s12 + $0x20] sm:$0xff] %vm1117_vm2, %v1112_v44 }
 0x2c7 PF: > { %s18_s29 = sadd.s32 1, %s1336_s29   ;;  %s1478_s27 = smov %s1332_s28 }
 0x2c8   : > { %p15_p5 = scmp.ge.s32.totalorder %s18_s29, 4   ;;  %s1479_s28 = smov %s1481_s30 }
 0x2ca   :  { %17 = sbr.rel (!%p15_p5) target bundleno = 2 (0x2), region = 85 }

// kernel: _lambda_.12
= control target key start
LH: loop header
LB: loop body
LE: loop exit
PB: predicated region body
PF: predicated region fallthrough
CT: control target
= control target key end

     0   :  { %s1351_s27 = smov 0   ;;  %s1353_s28 = smov 0   ;;  %s1434_s0 = inlined_call_operand.vmem [shape: f32[2,8,625], index: 0, kind: input, shape index: {}]   ;;  %s1435_s1 = inlined_call_operand.vmem [shape: f32[2,8,625], index: 1, kind: input, shape index: {}]   ;;  %s1436_s2 = inlined_call_operand.vmem [shape: f32[8,8], index: 2, kind: input, shape index: {}]   ;;  %s1437_s3 = inlined_call_operand.vmem [shape: f32[8,1], index: 3, kind: input, shape index: {}]   ;;  %s1438_s4 = inlined_call_operand.vmem [shape: f32[8,8], index: 4, kind: input, shape index: {}]   ;;  %s1439_s5 = inlined_call_operand.vmem [shape: f32[8,1], index: 5, kind: input, shape index: {}]   ;;  %s1440_s6 = inlined_call_operand.vmem [shape: f32[8,8], index: 6, kind: input, shape index: {}]   ;;  %s1441_s7 = inlined_call_operand.vmem [shape: f32[8,1], index: 7, kind: input, shape index: {}]   ;;  %s1442_s8 = inlined_call_operand.vmem [shape: f32[2,8,625], index: 8, kind: output, shape index: {}]  }
   0x1   :  { %s1355_s29 = smov 0  }
   0x2 LB: > { %s30_s30 = sadd.s32 1, %s1297_s28  ;;  %p1203_p0 = scmp.ge.s32.totalorder %s1301_s29, 1  ;;  %s1301_s29 = sphi %s1355_s29, %s18_s29   ;;  %s1297_s28 = sphi %s1353_s28, %s1444_s28   ;;  %s1293_s27 = sphi %s1351_s27, %s1443_s27  }
   0x3   : > { %p32_p1 = scmp.ge.s32.totalorder %s30_s30, 2  ;;  %p300_p2 = scmp.lt.s32.totalorder %s1301_s29, 3 }
   0x5   : > { %s1446_s30 = smov (%p32_p1, %s30_s30), 0  ;;  %p301_p3 = pnand %p1203_p0, %p300_p2 }
   0x6   : > { %p352_p4 = scmp.lt.s32.totalorder (!%p301_p3), %s1293_s27, 1  ;;  %v1303_v0 = vmov (!%p301_p3), 0.0   ;;  %v387_v1 = vld [vmem:[%s1437_s3] sm:$0xff] (!%p301_p3)  ;;  %v1304_v2 = vmov (!%p301_p3), 0   ;;  %vm393_vm0 = vcmask (!%p301_p3), 64512   ;;  %vm1305_vm1 = vmmov (!%p301_p3), 0  }
   0x7   : > { %304 = sbr.rel (%p301_p3) target bundleno = 695 (0x2b7), region = 52  ;;  %461 = vmatprep.mubr.f32.mxu0 (!%p301_p3), %v1303_v0  ;;  %532 = vmatprep.mubr.f32.mxu1 (!%p301_p3), %v1303_v0  ;;  %v610_v3 = vld [vmem:[%s1439_s5] sm:$0xff] (!%p301_p3)  ;;  %vm1092_vm2 = vcmask (!%p301_p3), 924672  }
   0x8   : > { %1267 = vset.pattern.permute.xlu0 (!%p301_p3), %v1304_v2  ;;  %1268 = vset.pattern.permute.xlu1 (!%p301_p3), %v1304_v2  ;;  %v386_v4 = vld [vmem:[%s1436_s2] sm:$0xff] (!%p301_p3) }
   0x9   : > { %390 = vperm.xlu0 (!%p301_p3), %1267, %v387_v1   ;;  %v609_v19 = vld [vmem:[%s1438_s4] sm:$0xff] (!%p301_p3) }
   0xa   : > { %v857_v23 = vld [vmem:[%s1441_s7] sm:$0xff] (!%p301_p3) }
   0xb   : > { %860 = vperm.xlu1 (!%p301_p3), %1268, %v857_v23   ;;  %v856_v60 = vld [vmem:[%s1440_s6] sm:$0xff] (!%p301_p3) }
   0xd   : > { %613 = vperm.xlu0 (!%p301_p3), %1267, %v610_v3  }
   0xe   : > { %s1448_s27 = smov (!%p352_p4, %s1293_s27), 1 }
   0xf   : > { %s1374_s11 = smul.u32 40, %s1448_s27 }
  0x11   : > { %s359_s16 = scalar_lea.vmem %s1434_s0, %s1374_s11  ;;  %s369_s27 = scalar_lea.vmem %s1435_s1, %s1374_s11 }
  0x12   : > { %v382_v5 = vld [vmem:[%s359_s16 + $0x8] sm:$0xff]  ;;  %v384_v6 = vld [vmem:[%s359_s16 + $0x18] sm:$0xff]  ;;  %v381_v7 = vld [vmem:[%s359_s16] sm:$0xff]  ;;  %s379_s12 = scalar_lea.vmem %s1442_s8, %s1374_s11 }
  0x13   : > { %397 = vmatprep.subr.mxu0 %v382_v5  ;;  %468 = vmatprep.subr.mxu1 %v384_v6  ;;  %v383_v8 = vld [vmem:[%s359_s16 + $0x10] sm:$0xff]  ;;  %v385_v9 = vld [vmem:[%s359_s16 + $0x20] sm:$0xff]  ;;  %v1079_v6 = vld [vmem:[%s369_s27 + $0x8] sm:$0xff] }
  0x14   : > { %398 = vmatpush1.msra.mxu0 %v381_v7  ;;  %469 = vmatpush1.msra.mxu1 %v383_v8  ;;  %v1078_v1 = vld [vmem:[%s369_s27] sm:$0xff]  ;;  %v1080_v3 = vld [vmem:[%s369_s27 + $0x10] sm:$0xff] }
  0x15   : > { %1207 = vmatmul.mubr.msk.f32.vlgmr.msra.gmra.mrb[0].mxu0 %vm393_vm0, %v386_v4  ;;  %1208 = vmatmul.mubr.msk.f32.vlgmr.msra.gmra.mrb[0].mxu1 %vm393_vm0, %v386_v4 }
  0x16   : > { %1224 = vmatprep.subr.mxu0 %v1303_v0  ;;  %1226 = vmatprep.mubr.msk.f32.mxu0 %vm1305_vm1, %v1303_v0 }
  0x17   : > { %1225 = vmatpush3.msra.mxu0 %v385_v9  ;;  %683 = vmatprep.mubr.f32.mxu1 %v1303_v0  ;;  %v1081_v9 = vld [vmem:[%s369_s27 + $0x18] sm:$0xff] }
  0x19   : > { %1227 = vmatmul.mubr.msk.f32.vlgmr.msra.gmra.mrb[2].mxu0 %vm393_vm0, %v386_v4 }
  0x1a   : > { %754 = vmatprep.mubr.f32.mxu0 %v1303_v0 }
  0x88   : > { %v391_v10 = vpop.permute.xlu0 %390 }
  0x8a   : > { %v861_v62 = vpop.permute.xlu1 %860 }
  0x8c   : > { %v614_v24 = vpop.permute.xlu0 %613 }
  0xe8   : > { %v463_v11 = vpop.f32.mrb[0].mxu0  ;;  %v534_v12 = vpop.f32.mrb[0].mxu1 }
  0xe9   : > { %v535_v13 = vadd.f32 %v534_v12, %v391_v10  ;;  %v465_v14 = vpop.f32.mrb[1].mxu0  ;;  %v536_v15 = vpop.f32.mrb[1].mxu1  ;;  %v464_v18 = vadd.f32 %v463_v11, %v391_v10 }
  0xea   : > { %v466_v16 = vadd.f32 %v465_v14, %v391_v10  ;;  %v537_v17 = vadd.f32 %v536_v15, %v391_v10 }
  0xec   : > { %v605_v20 = vpop.f32.mrb[2].mxu0  ;;  %619 = vmatprep.subr.mxu1 %v466_v16  ;;  %690 = vmatprep.subr.mxu0 %v537_v17  ;;  %v1082_v16 = vld [vmem:[%s369_s27 + $0x20] sm:$0xff] }
  0xed   : > { %v606_v21 = vadd.f32 %v605_v20, %v391_v10  ;;  %620 = vmatpush1.msra.mxu1 %v464_v18  ;;  %691 = vmatpush1.msra.mxu0 %v535_v13  ;;  %v1228_v22 = vpop.f32.mrb[3].mxu0 }
  0xee   : > { %1210 = vmatmul.mubr.msk.f32.vlgmr.msra.gmra.mrb[2].mxu1 %vm393_vm0, %v609_v19  ;;  %1211 = vmatmul.mubr.msk.f32.vlgmr.msra.gmra.mrb[4].mxu0 %vm393_vm0, %v609_v19 }
  0xef   : > { %1229 = vmatprep.subr.mxu1 %v1303_v0  ;;  %1231 = vmatprep.mubr.msk.f32.mxu1 %vm1305_vm1, %v1303_v0 }
  0xf0   : > { %1230 = vmatpush3.msra.mxu1 %v606_v21  ;;  %930 = vmatprep.mubr.f32.mxu0 %v1303_v0 }
  0xf2   : > { %1232 = vmatmul.mubr.msk.f32.vlgmr.msra.gmra.mrb[4].mxu1 %vm393_vm0, %v609_v19 }
  0xf3   : > { %1001 = vmatprep.mubr.f32.mxu1 %v1303_v0 }
 0x1c1   : > { %v685_v25 = vpop.f32.mrb[2].mxu1  ;;  %v756_v26 = vpop.f32.mrb[4].mxu0 }
 0x1c2   : > { %v686_v27 = vadd.f32 %v685_v25, %v614_v24  ;;  %v757_v28 = vadd.f32 %v756_v26, %v614_v24  ;;  %v687_v29 = vpop.f32.mrb[3].mxu1  ;;  %v758_v30 = vpop.f32.mrb[5].mxu0 }
 0x1c3   : > { %v688_v31 = vadd.f32 %v687_v29, %v614_v24  ;;  %v759_v32 = vadd.f32 %v758_v30, %v614_v24 }
 0x1c4   : > { %v836_v33 = vmul.f32 0.70710677, %v686_v27  ;;  %v838_v34 = vmul.f32 0.70710677, %v757_v28  ;;  %v831_v49 = vmul.f32 0.5, %v686_v27  ;;  %v833_v53 = vmul.f32 0.5, %v757_v28 }
 0x1c5   : > { %v837_v35 = vmul.f32 0.70710677, %v688_v31  ;;  %v839_v36 = vmul.f32 0.70710677, %v759_v32  ;;  %v827_v37 = vpop.f32.mrb[4].mxu1  ;;  %v832_v47 = vmul.f32 0.5, %v688_v31 }
 0x1c6   : > { %1269 = verf.f32 %v836_v33  ;;  %v828_v38 = vadd.f32 %v827_v37, %v614_v24  ;;  %v1233_v39 = vpop.f32.mrb[5].mxu1  ;;  %v834_v50 = vmul.f32 0.5, %v759_v32 }
 0x1c7   : > { %1271 = verf.f32 %v838_v34 }
 0x1c8   : > { %1273 = verf.f32 %v837_v35  ;;  %v840_v40 = vmul.f32 0.70710677, %v828_v38  ;;  %v835_v56 = vmul.f32 0.5, %v828_v38 }
 0x1c9   : > { %1275 = verf.f32 %v839_v36 }
 0x1ca   : > { %1277 = verf.f32 %v840_v40 }
 0x1d0   : > { %v1270_v41 = vpop.eup %1269 }
 0x1d1   : > { %v1272_v42 = vpop.eup %1271  ;;  %v846_v44 = vadd.f32 1.0, %v1270_v41 }
 0x1d2   : > { %v1274_v43 = vpop.eup %1273  ;;  %v848_v46 = vadd.f32 1.0, %v1272_v42 }
 0x1d3   : > { %v1276_v45 = vpop.eup %1275  ;;  %v847_v48 = vadd.f32 1.0, %v1274_v43  ;;  %v851_v55 = vmul.f32 %v846_v44, %v831_v49 }
 0x1d4   : > { %v849_v51 = vadd.f32 1.0, %v1276_v45  ;;  %v1278_v52 = vpop.eup %1277  ;;  %v853_v59 = vmul.f32 %v848_v46, %v833_v53 }
 0x1d5   : > { %v852_v54 = vmul.f32 %v847_v48, %v832_v47  ;;  %v850_v57 = vadd.f32 1.0, %v1278_v52 }
 0x1d6   : > { %v854_v58 = vmul.f32 %v849_v51, %v834_v50 }
 0x1d7   : > { %866 = vmatprep.subr.mxu0 %v852_v54  ;;  %v855_v61 = vmul.f32 %v850_v57, %v835_v56 }
 0x1d8   : > { %937 = vmatprep.subr.mxu1 %v854_v58  ;;  %867 = vmatpush1.msra.mxu0 %v851_v55 }
 0x1d9   : > { %938 = vmatpush1.msra.mxu1 %v853_v59  ;;  %1234 = vmatprep.subr.mxu0 %v1303_v0 }
 0x1da   : > { %1213 = vmatmul.mubr.msk.f32.vlgmr.msra.gmra.mrb[6].mxu0 %vm393_vm0, %v856_v60  ;;  %1214 = vmatmul.mubr.msk.f32.vlgmr.msra.gmra.mrb[6].mxu1 %vm393_vm0, %v856_v60 }
 0x1db   : > { %1235 = vmatpush3.msra.mxu0 %v855_v61  ;;  %1236 = vmatprep.mubr.msk.f32.mxu0 %vm1305_vm1, %v1303_v0 }
 0x1de   : > { %1237 = vmatmul.mubr.msk.f32.vlgmr.msra.gmra.mrb[8].mxu0 %vm393_vm0, %v856_v60 }
 0x2ad   : > { %v932_v63 = vpop.f32.mrb[6].mxu0  ;;  %v1003_v2 = vpop.f32.mrb[6].mxu1 }
 0x2ae   : > { %v933_v4 = vadd.f32 %v932_v63, %v861_v62  ;;  %v934_v5 = vpop.f32.mrb[7].mxu0  ;;  %v1004_v7 = vadd.f32 %v1003_v2, %v861_v62  ;;  %v1005_v8 = vpop.f32.mrb[7].mxu1 }
 0x2af   : > { %v935_v0 = vadd.f32 %v934_v5, %v861_v62  ;;  %v1006_v10 = vadd.f32 %v1005_v8, %v861_v62 }
 0x2b0   : > { %v1083_v11 = vadd.f32 %v1078_v1, %v933_v4  ;;  %v1085_v12 = vadd.f32 %v1080_v3, %v1004_v7 }
 0x2b1   : > { %v1084_v13 = vadd.f32 %v1079_v6, %v935_v0  ;;  %v1086_v14 = vadd.f32 %v1081_v9, %v1006_v10  ;;  %v1074_v15 = vpop.f32.mrb[8].mxu0 }
 0x2b2   : > { %1088 = vst [vmem:[%s379_s12] sm:$0xff] %v1083_v11  ;;  %1090 = vst [vmem:[%s379_s12 + $0x10] sm:$0xff] %v1085_v12  ;;  %v1075_v17 = vadd.f32 %v1074_v15, %v861_v62  ;;  %v1238_v18 = vpop.f32.mrb[9].mxu0 }
 0x2b3   : > { %1089 = vst [vmem:[%s379_s12 + $0x8] sm:$0xff] %v1084_v13  ;;  %1091 = vst [vmem:[%s379_s12 + $0x18] sm:$0xff] %v1086_v14 }
 0x2b4   : > { %v1087_v19 = vadd.f32 %v1082_v16, %v1075_v17 }
 0x2b6   : > { %1093 = vst.msk [vmem:[%s379_s12 + $0x20] sm:$0xff] %vm1092_vm2, %v1087_v19 }
 0x2b7 PF: > { %s18_s29 = sadd.s32 1, %s1301_s29   ;;  %s1443_s27 = smov %s1297_s28 }
 0x2b8   : > { %p15_p5 = scmp.ge.s32.totalorder %s18_s29, 4   ;;  %s1444_s28 = smov %s1446_s30 }
 0x2ba   :  { %17 = sbr.rel (!%p15_p5) target bundleno = 2 (0x2), region = 85 }

// kernel: _lambda_.13
= control target key start
LH: loop header
LB: loop body
LE: loop exit
PB: predicated region body
PF: predicated region fallthrough
CT: control target
= control target key end

     0   :  { %s652_s20 = smov 0   ;;  %s654_s21 = smov 0   ;;  %s700_s0 = inlined_call_operand.vmem [shape: f32[2,8,256], index: 0, kind: input, shape index: {}]   ;;  %s701_s1 = inlined_call_operand.vmem [shape: f32[8,8], index: 1, kind: input, shape index: {}]   ;;  %s702_s2 = inlined_call_operand.vmem [shape: f32[8,1], index: 2, kind: input, shape index: {}]   ;;  %s703_s3 = inlined_call_operand.vmem [shape: f32[1,8], index: 3, kind: input, shape index: {}]   ;;  %s704_s4 = inlined_call_operand.<no memory space> [shape: f32[1,1], index: 4, kind: input, shape index: {}]   ;;  %s705_s5 = inlined_call_operand.vmem [shape: f32[2,1,256], index: 5, kind: output, shape index: {}]  }
   0x1   :  { %v10_v0 = vstv %s704_s4  ;;  %s656_s22 = smov 0  }
   0x2   :  { %11 = vst [vmem:[#allocation2] sm:$0x1] %v10_v0 }
   0x3 LB: > { %s29_s4 = sadd.s32 1, %s610_s21  ;;  %p551_p0 = scmp.ge.s32.totalorder %s614_s22, 1  ;;  %s614_s22 = sphi %s656_s22, %s17_s22   ;;  %s610_s21 = sphi %s654_s21, %s707_s21   ;;  %s606_s20 = sphi %s652_s20, %s706_s20  }
   0x4   : > { %p31_p1 = scmp.ge.s32.totalorder %s29_s4, 2  ;;  %p210_p2 = scmp.lt.s32.totalorder %s614_s22, 3 }
   0x6   : > { %s709_s4 = smov (%p31_p1, %s29_s4), 0  ;;  %p211_p3 = pnand %p551_p0, %p210_p2 }
   0x7   : > { %p246_p4 = scmp.lt.s32.totalorder (!%p211_p3), %s606_s20, 1  ;;  %v267_v1 = vld [vmem:[%s702_s2] sm:$0xff] (!%p211_p3)  ;;  %v616_v2 = vmov (!%p211_p3), 0.0   ;;  %v617_v3 = vmov (!%p211_p3), 0   ;;  %vm273_vm0 = vcmask (!%p211_p3), 64512   ;;  %v365_v24 = vlaneseq (!%p211_p3) }
   0x8   : > { %214 = sbr.rel (%p211_p3) target bundleno = 477 (0x1dd), region = 40  ;;  %341 = vmatprep.mubr.f32.mxu0 (!%p211_p3), %v616_v2  ;;  %587 = vset.pattern.permute.xlu0 (!%p211_p3), %v617_v3  ;;  %v264_v7 = vld [vmem:[%s701_s1] sm:$0xff] (!%p211_p3)  ;;  %v618_v26 = vmov (!%p211_p3), 1966171168  }
   0x9   : > { %270 = vperm.xlu0 (!%p211_p3), %587, %v267_v1   ;;  %436 = vmatprep.mubr.f32.mxu1 (!%p211_p3), %v616_v2  ;;  %v359_v4 = vld [vmem:[#allocation2] sm:$0x1] (!%p211_p3)  ;;  %v366_v25 = vshrl.u32 (!%p211_p3), %v365_v24, 7  ;;  %v447_v27 = vunpack.c.l.s4 (!%p211_p3), %v618_v26  ;;  %vm463_vm1 = vcmp.lt.s32.totalorder (!%p211_p3), %v365_v24, 256 }
   0xa   : > { %v358_v23 = vld [vmem:[%s703_s3] sm:$0x1] (!%p211_p3) }
   0xb   : > { %v367_v28 = vsub.s32 (!%p211_p3), 0, %v366_v25  ;;  %v448_v30 = vunpack.c.0.s8 (!%p211_p3), %v447_v27 }
   0xd   : > { %362 = vperm.xlu0 (!%p211_p3), %587, %v359_v4   ;;  %v451_v36 = vsub.s32 (!%p211_p3), %v448_v30, %v366_v25 }
   0xf   : > { %s711_s20 = smov (!%p246_p4, %s606_s20), 1 }
  0x10   : > { %s559_s25 = sshll.u32 %s711_s20, 4  ;;  %s554_s8 = sshll.u32 %s711_s20, 1 }
  0x11   : > { %s253_s28 = scalar_lea.vmem %s700_s0, %s559_s25  ;;  %s262_s11 = scalar_lea.vmem %s705_s5, %s554_s8 }
  0x12   : > { %v266_v5 = vld [vmem:[%s253_s28 + $0x8] sm:$0xff]  ;;  %v265_v6 = vld [vmem:[%s253_s28] sm:$0xff] }
  0x13   : > { %277 = vmatprep.subr.mxu0 %v266_v5 }
  0x14   : > { %278 = vmatpush1.msra.mxu0 %v265_v6 }
  0x15   : > { %555 = vmatmul.mubr.msk.f32.vlgmr.msra.gmra.mrb[0].mxu0 %vm273_vm0, %v264_v7 }
  0x88   : > { %v271_v8 = vpop.permute.xlu0 %270 }
  0x8c   : > { %v363_v29 = vpop.permute.xlu0 %362 }
  0x8d   : > { %v368_v31 = vrot.slane %v363_v29, %v367_v28 }
  0xe8   : > { %v343_v9 = vpop.f32.mrb[0].mxu0 }
  0xe9   : > { %v344_v10 = vadd.f32 %v343_v9, %v271_v8  ;;  %v345_v11 = vpop.f32.mrb[1].mxu0 }
  0xea   : > { %v346_v12 = vadd.f32 %v345_v11, %v271_v8 }
  0xeb   : > { %v350_v13 = vmul.f32 0.70710677, %v344_v10  ;;  %v348_v20 = vmul.f32 0.5, %v344_v10 }
  0xec   : > { %v351_v14 = vmul.f32 0.70710677, %v346_v12  ;;  %v349_v18 = vmul.f32 0.5, %v346_v12 }
  0xed   : > { %588 = verf.f32 %v350_v13 }
  0xee   : > { %590 = verf.f32 %v351_v14 }
  0xf7   : > { %v589_v15 = vpop.eup %588 }
  0xf8   : > { %v591_v16 = vpop.eup %590  ;;  %v354_v17 = vadd.f32 1.0, %v589_v15 }
  0xf9   : > { %v355_v19 = vadd.f32 1.0, %v591_v16 }
  0xfa   : > { %v356_v22 = vmul.f32 %v354_v17, %v348_v20 }
  0xfb   : > { %v357_v21 = vmul.f32 %v355_v19, %v349_v18 }
  0xfd   : > { %372 = vmatprep.subr.mxu1 %v357_v21 }
  0xfe   : > { %373 = vmatpush1.msra.mxu1 %v356_v22 }
  0xff   : > { %556 = vmatmul.mubr.msk.f32.vlgmr.msra.gmra.mrb[0].mxu1 %vm273_vm0, %v358_v23 }
 0x1d2   : > { %v438_v32 = vpop.f32.mrb[0].mxu1 }
 0x1d3   : > { %v439_v33 = vadd.f32 %v438_v32, %v368_v31  ;;  %v440_v34 = vpop.f32.mrb[1].mxu1 }
 0x1d4   : > { %v441_v35 = vadd.f32 %v440_v34, %v368_v31 }
 0x1d6   : > { %v445_v37 = vcombine.low %v439_v33, %v441_v35 }
 0x1d8   : > { %v452_v38 = vrot.slane %v445_v37, %v451_v36 }
 0x1da   : > { %v459_v39 = vrot.slane %v452_v38, %v451_v36 }
 0x1dc   : > { %465 = vst.msk [vmem:[%s262_s11] sm:$0x3] %vm463_vm1, %v459_v39 }
 0x1dd PF: > { %s17_s22 = sadd.s32 1, %s614_s22   ;;  %s706_s20 = smov %s610_s21 }
 0x1de   : > { %p14_p5 = scmp.ge.s32.totalorder %s17_s22, 4   ;;  %s707_s21 = smov %s709_s4 }
 0x1e0   :  { %16 = sbr.rel (!%p14_p5) target bundleno = 3 (0x3), region = 70 }

</bundles_post_ra>
